<compile_context>
chip_gen: v7x
topology: tpu7x:2x2x1
jax: 0.10.0
libtpu: 0.0.40
codegen_flags: <defaults>
</compile_context>

<pallas_src>
import functools

import jax
import jax.numpy as jnp
from jax import lax
from jax.experimental import pallas as pl
from jax.experimental.pallas import tpu as pltpu


def time_mixing_kernel(x_ref, tmk_ref, tmv_ref, tmr_ref, u_ref, w_ref,
                       wkT_ref, wvT_ref, wrT_ref, woT_ref, bo_ref,
                       out_ref,
                       xs_scr, k_scr, v_scr, r_scr, a_all, b_all,
                       a_c, b_c, xprev_c,
                       *, batch_rows, t_chunk, compute_dtype, approx_recip,
                       unroll):
    """One grid step = one (batch block, T chunk) tile.

    The x block is (1, rows, D) with rows = t_chunk * batch_rows, laid out
    time-major: row = t_local * batch_rows + b_local, so every serial time
    step touches one contiguous, sublane-aligned (batch_rows, D) slab.
    """
    tt = pl.program_id(1)
    rows = k_scr.shape[0]
    bb = batch_rows
    cd = compute_dtype

    # ---- init carried state at the start of each sequence (first T chunk) ----
    @pl.when(tt == 0)
    def _init():
        a_c[...] = jnp.zeros_like(a_c)
        b_c[...] = jnp.zeros_like(b_c)
        xprev_c[...] = jnp.zeros_like(xprev_c)   # ZeroPad2d zero row at t=0

    x = x_ref[0]                                 # (rows, D) f32

    # ---- time shift derived in-kernel: xs[t] = x[t-1] -------------------------
    xs_scr[pl.ds(0, bb), :] = xprev_c[...]       # previous chunk's last step
    if rows > bb:                                # static python check
        xs_scr[pl.ds(bb, rows - bb), :] = x[:rows - bb]
    xprev_c[...] = x[rows - bb:]                 # carry for the next chunk
    xs = xs_scr[...]

    # ---- time mixing (shared x - xs term) + k/v/r projections (MXU) ----------
    d = x - xs
    key_mix = xs + d * tmk_ref[...]
    val_mix = xs + d * tmv_ref[...]
    rec_mix = jax.nn.sigmoid(xs + d * tmr_ref[...])

    k_scr[...] = jnp.dot(key_mix.astype(cd), wkT_ref[...],
                         preferred_element_type=jnp.float32)
    v_scr[...] = jnp.dot(val_mix.astype(cd), wvT_ref[...],
                         preferred_element_type=jnp.float32)
    r_scr[...] = jnp.dot(rec_mix.astype(cd), wrT_ref[...],
                         preferred_element_type=jnp.float32)

    # ---- hoist all carry-independent math out of the serial recurrence --------
    # e1 / e2 / e2*v depend only on k and v, so they are computed once,
    # vectorized over the whole chunk, and staged in the now-dead scratch:
    #   xs_scr <- e2       v_scr <- e2 * v       k_scr <- e1
    u = u_ref[...]                               # (1, D)
    w = w_ref[...]                               # (1, D)
    uk = u + k_scr[...]
    q = jnp.maximum(uk, w)
    e2 = jnp.exp(uk - q)
    v_scr[...] = e2 * v_scr[...]                 # v rows are dead after this
    xs_scr[...] = e2                             # xs rows are dead after the mixes
    k_scr[...] = jnp.exp(-w - q)                 # k rows are dead after uk

    # ---- serial WKV recurrence: body is just 4 FMAs per step ------------------
    # a_t / b_t go to dedicated scratch (never read inside the loop), so no
    # false RAW/WAR ordering on the e1/e2/e2v buffers can serialize steps.
    def step(i, carry):
        a, b = carry                             # (bb, D) vreg-carried state
        o = pl.multiple_of(i * bb, bb)
        e1_t = k_scr[pl.ds(o, bb), :]
        e2_t = xs_scr[pl.ds(o, bb), :]
        e2v_t = v_scr[pl.ds(o, bb), :]
        a = e1_t * a + e2v_t
        b = e1_t * b + e2_t
        a_all[pl.ds(o, bb), :] = a
        b_all[pl.ds(o, bb), :] = b
        return a, b

    a_out, b_out = lax.fori_loop(0, t_chunk, step, (a_c[...], b_c[...]),
                                 unroll=unroll)
    a_c[...] = a_out                             # carry into the next T chunk
    b_c[...] = b_out

    # ---- wkv = a / b hoisted out of the loop (one vectorized pass) ------------
    if approx_recip:
        wkv = a_all[...] * pl.reciprocal(b_all[...], approx=True)
    else:
        wkv = a_all[...] / b_all[...]

    # ---- output projection (ln_out: Linear with bias) -------------------------
    out = jnp.dot((wkv * r_scr[...]).astype(cd), woT_ref[...],
                  preferred_element_type=jnp.float32) + bo_ref[...]
    out_ref[0] = out.astype(out_ref.dtype)


def _round_up(n, m):
    return -(-n // m) * m


def _pick_batch_block(B, batch_block):
    """Batch rows per grid step: a multiple of 8 sublanes (aligned (Bb, D)
    slabs in the serial loop); keep >= 2 blocks when the batch allows it so
    the 'parallel' grid axis can span both v7x TensorCores / the megacore."""
    b8 = _round_up(B, 8)
    bb = min(_round_up(max(batch_block, 1), 8), b8)
    if b8 // bb < 2 and b8 >= 16:
        bb = max(8, (b8 // 2) // 8 * 8)
    b_pad = _round_up(B, bb)
    return bb, b_pad


def _pick_t_chunk(T, bb, D, weight_bytes, vmem_budget, target_rows):
    """Largest divisor Tc of T whose chunk fits the VMEM budget:
    6 f32 (rows, D) scratch buffers + double-buffered in/out blocks."""
    per_row = 10 * D * 4
    avail = max(vmem_budget - weight_bytes - (1 << 20), per_row * bb)
    max_rows = max(min(avail // per_row, target_rows), bb)
    best = 1
    for d in range(1, T + 1):
        if T % d == 0 and d * bb <= max_rows:
            best = d
    return best


def time_mixing_pallas(x, params, *, compute_dtype=jnp.float32,
                       approx_reciprocal=False, batch_block=8,
                       target_chunk_rows=1024,
                       vmem_budget_bytes=40 * 1024 * 1024):
    B, T, D = x.shape
    f32 = jnp.float32
    cd = jnp.dtype(compute_dtype)

    Bb, B_pad = _pick_batch_block(B, batch_block)
    n_bb = B_pad // Bb

    weight_bytes = 2 * 4 * D * D * cd.itemsize       # 4 weights, double-buffered
    Tc = _pick_t_chunk(T, Bb, D, weight_bytes, vmem_budget_bytes,
                       target_chunk_rows)
    n_tt = T // Tc
    rows = Tc * Bb

    xp = x.astype(f32)
    if B_pad != B:
        xp = jnp.pad(xp, ((0, B_pad - B), (0, 0), (0, 0)))

    # (B_pad, T, D) -> (n_bb, T*Bb, D), time-major within each batch block so
    # the serial recurrence reads/writes contiguous (Bb, D) slabs per step.
    # TODO(synk): fold this relayout (and its inverse below) into the kernel
    # once an efficient in-kernel (Bb, Tc, D)->(Tc, Bb, D) relayout is
    # guaranteed to lower in Mosaic; today the HBM-side XLA transpose is the
    # safe path even though it adds read+write HBM traffic.
    xr = (xp.reshape(n_bb, Bb, T, D)
            .transpose(0, 2, 1, 3)
            .reshape(n_bb, T * Bb, D))

    # Weights are stored pre-transposed (W^T) at init; only (optionally) cast.
    wkT = params["wkT"].astype(cd)
    wvT = params["wvT"].astype(cd)
    wrT = params["wrT"].astype(cd)
    woT = params["woT"].astype(cd)

    # With the hoisted loop body (tiny), unroll=8 does not create vreg spills.
    unroll = 8 if Tc % 8 == 0 else (4 if Tc % 4 == 0 else (2 if Tc % 2 == 0 else 1))
    kernel = functools.partial(
        time_mixing_kernel, batch_rows=Bb, t_chunk=Tc, compute_dtype=cd,
        approx_recip=approx_reciprocal, unroll=unroll)

    seq_spec = pl.BlockSpec((1, rows, D), lambda i, j: (i, j, 0))
    vec_spec = pl.BlockSpec((1, D), lambda i, j: (0, 0))
    mat_spec = pl.BlockSpec((D, D), lambda i, j: (0, 0))

    cost = pl.CostEstimate(
        flops=int(2 * 4 * B_pad * T * D * D),          # 4 dense projections
        transcendentals=int(3 * B_pad * T * D),        # 2 exps + sigmoid / elem
        bytes_accessed=int(2 * B_pad * T * D * 4 + 4 * D * D * cd.itemsize))

    out_r = pl.pallas_call(
        kernel,
        out_shape=jax.ShapeDtypeStruct((n_bb, T * Bb, D), x.dtype),
        grid_spec=pltpu.PrefetchScalarGridSpec(
            num_scalar_prefetch=0,
            # NOTE: the T-chunk axis must stay LAST (innermost, sequential)
            # and "arbitrary" -- the a/b/x[t-1] scratch carries the recurrence
            # state across it.  Do not reorder the grid or mark it parallel.
            grid=(n_bb, n_tt),
            in_specs=[seq_spec,
                      vec_spec, vec_spec, vec_spec,    # time_mix k / v / r
                      vec_spec, vec_spec,              # u, w
                      mat_spec, mat_spec, mat_spec,    # Wk^T, Wv^T, Wr^T
                      mat_spec, vec_spec],             # Wo^T, bias
            out_specs=seq_spec,
            scratch_shapes=[
                pltpu.VMEM((rows, D), f32),            # xs, reused for e2
                pltpu.VMEM((rows, D), f32),            # k,  reused for e1
                pltpu.VMEM((rows, D), f32),            # v,  reused for e2*v
                pltpu.VMEM((rows, D), f32),            # r
                pltpu.VMEM((rows, D), f32),            # a_t history (loop write-only)
                pltpu.VMEM((rows, D), f32),            # b_t history (loop write-only)
                pltpu.VMEM((Bb, D), f32),              # a carry across T chunks
                pltpu.VMEM((Bb, D), f32),              # b carry across T chunks
                pltpu.VMEM((Bb, D), f32),              # x[t-1] carry (time shift)
            ]),
        compiler_params=pltpu.CompilerParams(
            dimension_semantics=("parallel", "arbitrary"),
            vmem_limit_bytes=48 * 1024 * 1024),
        cost_estimate=cost,
    )(xr,
      params["tmk"].astype(f32), params["tmv"].astype(f32),
      params["tmr"].astype(f32),
      params["u"].astype(f32), params["w"].astype(f32),
      wkT, wvT, wrT, woT, params["bo"].astype(f32))

    out = (out_r.reshape(n_bb, T, Bb, D)
                .transpose(0, 2, 1, 3)
                .reshape(B_pad, T, D))
    return out[:B] if B_pad != B else out


def time_mixing_ref(x, p):
    """Pure-JAX reference matching the PyTorch TimeMixing.forward exactly."""
    B, T, D = x.shape
    hp = lax.Precision.HIGHEST
    xs = jnp.concatenate([jnp.zeros((B, 1, D), x.dtype), x[:, :-1, :]], axis=1)
    key = x * p["tmk"] + xs * (1.0 - p["tmk"])
    val = x * p["tmv"] + xs * (1.0 - p["tmv"])
    rec = jax.nn.sigmoid(x * p["tmr"] + xs * (1.0 - p["tmr"]))
    k = jnp.dot(key, p["wkT"], precision=hp)
    v = jnp.dot(val, p["wvT"], precision=hp)
    r = jnp.dot(rec, p["wrT"], precision=hp)
    u = p["u"][0]
    w = p["w"][0]

    def step(carry, kv):
        a, b = carry
        kt, vt = kv
        q = jnp.maximum(u + kt, w)
        e1 = jnp.exp(-w - q)
        e2 = jnp.exp(u + kt - q)
        a = e1 * a + e2 * vt
        b = e1 * b + e2
        return (a, b), a / b

    a0 = jnp.zeros((B, D), jnp.float32)
    b0 = jnp.zeros((B, D), jnp.float32)
    _, wkv = lax.scan(step, (a0, b0),
                      (jnp.swapaxes(k, 0, 1), jnp.swapaxes(v, 0, 1)))
    wkv = jnp.swapaxes(wkv, 0, 1)                    # (B, T, D)
    return jnp.dot(wkv * r, p["woT"], precision=hp) + p["bo"][0]


def init_params(dim, key):
    ks = jax.random.split(key, 10)
    scale = 1.0 / jnp.sqrt(jnp.float32(dim))

    def linear_t(k):
        # PyTorch Linear stores W as (out, in); keep W^T = (in, out) so the
        # kernel never transposes at call time.
        w = jax.random.normal(k, (dim, dim), jnp.float32) * scale
        return w.T

    return {
        # The module initializes these to ones; random values exercise the
        # time-shift / decay paths of the forward more thoroughly.
        "u":   jax.random.normal(ks[0], (1, dim), jnp.float32) * 0.5,
        "w":   jax.random.normal(ks[1], (1, dim), jnp.float32) * 0.5,
        "tmk": jax.random.uniform(ks[2], (1, dim), jnp.float32),
        "tmv": jax.random.uniform(ks[3], (1, dim), jnp.float32),
        "tmr": jax.random.uniform(ks[4], (1, dim), jnp.float32),
        "wkT": linear_t(ks[5]),
        "wvT": linear_t(ks[6]),
        "wrT": linear_t(ks[7]),
        "woT": linear_t(ks[8]),
        "bo":  jax.random.normal(ks[9], (1, dim), jnp.float32) * 0.1,
    }


def _run_case(base_key, B, T, D, tol=2e-3, **kw):
    kx, kp = jax.random.split(
        jax.random.fold_in(base_key, B * 100000 + T * 1000 + D))
    x = jax.random.normal(kx, (B, T, D), jnp.float32)
    p = init_params(D, kp)
    out = jax.block_until_ready(time_mixing_pallas(x, p, **kw))
    ref = jax.block_until_ready(time_mixing_ref(x, p))
    assert out.shape == (B, T, D)
    err = float(jnp.max(jnp.abs(out - ref)))
    assert jnp.allclose(out, ref, rtol=tol, atol=tol), f"max abs err = {err}"


if __name__ == "__main__":
    key = jax.random.PRNGKey(0)
    # B=2 is padded to one 8-row batch block; single T chunk.
    _run_case(key, 2, 8, 32)
    # Multiple T chunks: exercises the carried (a, b, x[t-1]) scratch state.
    _run_case(key, 2, 8, 32, target_chunk_rows=32)
    # Two batch blocks (parallel grid axis / 2 TensorCores) x two T chunks.
    _run_case(key, 16, 8, 128, batch_block=8, target_chunk_rows=32)
    # bf16 MXU path for the four projections (recurrence stays f32);
    # tolerance gated on the compute dtype per the review.
    _run_case(key, 4, 8, 128, tol=1e-1, compute_dtype=jnp.bfloat16)
    print("KERNEL_OK")
</pallas_src>

<mosaic_0001>
module attributes {stable_mosaic.version = 11 : i64} {
  func.func @time_mixing_kernel(%arg0: i32, %arg1: i32, %arg2: memref<1x64x32xf32, #tpu.memory_space<vmem>>, %arg3: memref<1x32xf32, #tpu.memory_space<vmem>>, %arg4: memref<1x32xf32, #tpu.memory_space<vmem>>, %arg5: memref<1x32xf32, #tpu.memory_space<vmem>>, %arg6: memref<1x32xf32, #tpu.memory_space<vmem>>, %arg7: memref<1x32xf32, #tpu.memory_space<vmem>>, %arg8: memref<32x32xf32, #tpu.memory_space<vmem>>, %arg9: memref<32x32xf32, #tpu.memory_space<vmem>>, %arg10: memref<32x32xf32, #tpu.memory_space<vmem>>, %arg11: memref<32x32xf32, #tpu.memory_space<vmem>>, %arg12: memref<1x32xf32, #tpu.memory_space<vmem>>, %arg13: memref<1x64x32xf32, #tpu.memory_space<vmem>>, %arg14: memref<64x32xf32, #tpu.memory_space<vmem>>, %arg15: memref<64x32xf32, #tpu.memory_space<vmem>>, %arg16: memref<64x32xf32, #tpu.memory_space<vmem>>, %arg17: memref<64x32xf32, #tpu.memory_space<vmem>>, %arg18: memref<64x32xf32, #tpu.memory_space<vmem>>, %arg19: memref<64x32xf32, #tpu.memory_space<vmem>>, %arg20: memref<8x32xf32, #tpu.memory_space<vmem>>, %arg21: memref<8x32xf32, #tpu.memory_space<vmem>>, %arg22: memref<8x32xf32, #tpu.memory_space<vmem>>) attributes {dimension_semantics = [#tpu.dimension_semantics<parallel>, #tpu.dimension_semantics<arbitrary>], iteration_bounds = array<i64: 1, 1>, scalar_prefetch = 0 : i64, scratch_operands = 9 : i64, tpu.core_type = #tpu.core_type<tc>, window_params = [{transform_indices = @transform_0, window_bounds = array<i64: 1, 64, 32>}, {pipeline_mode = #tpu.pipeline_mode<synchronous>, transform_indices = @transform_1, window_bounds = array<i64: 1, 32>}, {pipeline_mode = #tpu.pipeline_mode<synchronous>, transform_indices = @transform_2, window_bounds = array<i64: 1, 32>}, {pipeline_mode = #tpu.pipeline_mode<synchronous>, transform_indices = @transform_3, window_bounds = array<i64: 1, 32>}, {pipeline_mode = #tpu.pipeline_mode<synchronous>, transform_indices = @transform_4, window_bounds = array<i64: 1, 32>}, {pipeline_mode = #tpu.pipeline_mode<synchronous>, transform_indices = @transform_5, window_bounds = array<i64: 1, 32>}, {pipeline_mode = #tpu.pipeline_mode<synchronous>, transform_indices = @transform_6, window_bounds = array<i64: 32, 32>}, {pipeline_mode = #tpu.pipeline_mode<synchronous>, transform_indices = @transform_7, window_bounds = array<i64: 32, 32>}, {pipeline_mode = #tpu.pipeline_mode<synchronous>, transform_indices = @transform_8, window_bounds = array<i64: 32, 32>}, {pipeline_mode = #tpu.pipeline_mode<synchronous>, transform_indices = @transform_9, window_bounds = array<i64: 32, 32>}, {pipeline_mode = #tpu.pipeline_mode<synchronous>, transform_indices = @transform_10, window_bounds = array<i64: 1, 32>}, {transform_indices = @transform_11, window_bounds = array<i64: 1, 64, 32>}]} {
    %c0_i32 = arith.constant 0 : i32
    %0 = arith.cmpi eq, %arg1, %c0_i32 : i32
    %1 = arith.extui %0 : i1 to i32
    %c0_i32_0 = arith.constant 0 : i32
    %2 = arith.cmpi ne, %1, %c0_i32_0 : i32
    scf.if %2 {
      %cst_119 = arith.constant 0.000000e+00 : f32
      %203 = vector.broadcast %cst_119 : f32 to vector<8x32xf32>
      %c0_120 = arith.constant 0 : index
      %c0_121 = arith.constant 0 : index
      %204 = vector.load %arg20[%c0_120, %c0_121] : memref<8x32xf32, #tpu.memory_space<vmem>>, vector<8x32xf32>
      tpu.vector_store %arg20[%c0_120, %c0_121], %203 {strides = array<i32>} : memref<8x32xf32, #tpu.memory_space<vmem>>, vector<8x32xf32>,
      %cst_122 = arith.constant 0.000000e+00 : f32
      %205 = vector.broadcast %cst_122 : f32 to vector<8x32xf32>
      %c0_123 = arith.constant 0 : index
      %c0_124 = arith.constant 0 : index
      %206 = vector.load %arg21[%c0_123, %c0_124] : memref<8x32xf32, #tpu.memory_space<vmem>>, vector<8x32xf32>
      tpu.vector_store %arg21[%c0_123, %c0_124], %205 {strides = array<i32>} : memref<8x32xf32, #tpu.memory_space<vmem>>, vector<8x32xf32>,
      %cst_125 = arith.constant 0.000000e+00 : f32
      %207 = vector.broadcast %cst_125 : f32 to vector<8x32xf32>
      %c0_126 = arith.constant 0 : index
      %c0_127 = arith.constant 0 : index
      %208 = vector.load %arg22[%c0_126, %c0_127] : memref<8x32xf32, #tpu.memory_space<vmem>>, vector<8x32xf32>
      tpu.vector_store %arg22[%c0_126, %c0_127], %207 {strides = array<i32>} : memref<8x32xf32, #tpu.memory_space<vmem>>, vector<8x32xf32>,
    } else {
    }
    %c0 = arith.constant 0 : index
    %c0_1 = arith.constant 0 : index
    %c0_2 = arith.constant 0 : index
    %3 = vector.load %arg2[%c0, %c0_1, %c0_2] : memref<1x64x32xf32, #tpu.memory_space<vmem>>, vector<1x64x32xf32>
    %4 = vector.shape_cast %3 : vector<1x64x32xf32> to vector<64x32xf32>
    %c0_3 = arith.constant 0 : index
    %c0_4 = arith.constant 0 : index
    %5 = vector.load %arg22[%c0_3, %c0_4] : memref<8x32xf32, #tpu.memory_space<vmem>>, vector<8x32xf32>
    %c0_5 = arith.constant 0 : index
    %c0_6 = arith.constant 0 : index
    %6 = vector.load %arg14[%c0_5, %c0_6] : memref<64x32xf32, #tpu.memory_space<vmem>>, vector<8x32xf32>
    tpu.vector_store %arg14[%c0_5, %c0_6], %5 {strides = array<i32>} : memref<64x32xf32, #tpu.memory_space<vmem>>, vector<8x32xf32>,
    %7 = vector.extract_strided_slice %4 {offsets = [0, 0], sizes = [56, 32], strides = [1, 1]} : vector<64x32xf32> to vector<56x32xf32>
    %c8 = arith.constant 8 : index
    %c0_7 = arith.constant 0 : index
    %8 = vector.load %arg14[%c8, %c0_7] : memref<64x32xf32, #tpu.memory_space<vmem>>, vector<56x32xf32>
    tpu.vector_store %arg14[%c8, %c0_7], %7 {strides = array<i32>} : memref<64x32xf32, #tpu.memory_space<vmem>>, vector<56x32xf32>,
    %9 = vector.extract_strided_slice %4 {offsets = [56, 0], sizes = [8, 32], strides = [1, 1]} : vector<64x32xf32> to vector<8x32xf32>
    %c0_8 = arith.constant 0 : index
    %c0_9 = arith.constant 0 : index
    %10 = vector.load %arg22[%c0_8, %c0_9] : memref<8x32xf32, #tpu.memory_space<vmem>>, vector<8x32xf32>
    tpu.vector_store %arg22[%c0_8, %c0_9], %9 {strides = array<i32>} : memref<8x32xf32, #tpu.memory_space<vmem>>, vector<8x32xf32>,
    %c0_10 = arith.constant 0 : index
    %c0_11 = arith.constant 0 : index
    %11 = vector.load %arg14[%c0_10, %c0_11] : memref<64x32xf32, #tpu.memory_space<vmem>>, vector<64x32xf32>
    %12 = arith.subf %4, %11 : vector<64x32xf32>
    %c0_12 = arith.constant 0 : index
    %c0_13 = arith.constant 0 : index
    %13 = vector.load %arg3[%c0_12, %c0_13] : memref<1x32xf32, #tpu.memory_space<vmem>>, vector<1x32xf32>
    %14 = vector.broadcast %13 : vector<1x32xf32> to vector<64x32xf32>
    %15 = arith.mulf %12, %14 : vector<64x32xf32>
    %16 = arith.addf %11, %15 : vector<64x32xf32>
    %c0_14 = arith.constant 0 : index
    %c0_15 = arith.constant 0 : index
    %17 = vector.load %arg4[%c0_14, %c0_15] : memref<1x32xf32, #tpu.memory_space<vmem>>, vector<1x32xf32>
    %18 = vector.broadcast %17 : vector<1x32xf32> to vector<64x32xf32>
    %19 = arith.mulf %12, %18 : vector<64x32xf32>
    %20 = arith.addf %11, %19 : vector<64x32xf32>
    %c0_16 = arith.constant 0 : index
    %c0_17 = arith.constant 0 : index
    %21 = vector.load %arg5[%c0_16, %c0_17] : memref<1x32xf32, #tpu.memory_space<vmem>>, vector<1x32xf32>
    %22 = vector.broadcast %21 : vector<1x32xf32> to vector<64x32xf32>
    %23 = arith.mulf %12, %22 : vector<64x32xf32>
    %24 = arith.addf %11, %23 : vector<64x32xf32>
    %25 = arith.negf %24 : vector<64x32xf32>
    %26 = math.exp %25 : vector<64x32xf32>
    %cst = arith.constant 1.000000e+00 : f32
    %27 = vector.broadcast %cst : f32 to vector<64x32xf32>
    %28 = arith.addf %27, %26 : vector<64x32xf32>
    %29 = arith.divf %27, %28 : vector<64x32xf32>
    %c0_18 = arith.constant 0 : index
    %c0_19 = arith.constant 0 : index
    %30 = vector.load %arg8[%c0_18, %c0_19] : memref<32x32xf32, #tpu.memory_space<vmem>>, vector<32x32xf32>
    %cst_20 = arith.constant dense<0.000000e+00> : vector<64x32xf32>
    %31 = tpu.matmul %16, %30, %cst_20 {dimension_numbers = #tpu.dot_dimension_numbers<[1], [0], [0], [1], [0, 0, 1, 1], [], []>} : vector<64x32xf32>, vector<32x32xf32>, vector<64x32xf32> -> vector<64x32xf32>
    %c0_21 = arith.constant 0 : index
    %c0_22 = arith.constant 0 : index
    %32 = vector.load %arg15[%c0_21, %c0_22] : memref<64x32xf32, #tpu.memory_space<vmem>>, vector<64x32xf32>
    tpu.vector_store %arg15[%c0_21, %c0_22], %31 {strides = array<i32>} : memref<64x32xf32, #tpu.memory_space<vmem>>, vector<64x32xf32>,
    %c0_23 = arith.constant 0 : index
    %c0_24 = arith.constant 0 : index
    %33 = vector.load %arg9[%c0_23, %c0_24] : memref<32x32xf32, #tpu.memory_space<vmem>>, vector<32x32xf32>
    %cst_25 = arith.constant dense<0.000000e+00> : vector<64x32xf32>
    %34 = tpu.matmul %20, %33, %cst_25 {dimension_numbers = #tpu.dot_dimension_numbers<[1], [0], [0], [1], [0, 0, 1, 1], [], []>} : vector<64x32xf32>, vector<32x32xf32>, vector<64x32xf32> -> vector<64x32xf32>
    %c0_26 = arith.constant 0 : index
    %c0_27 = arith.constant 0 : index
    %35 = vector.load %arg16[%c0_26, %c0_27] : memref<64x32xf32, #tpu.memory_space<vmem>>, vector<64x32xf32>
    tpu.vector_store %arg16[%c0_26, %c0_27], %34 {strides = array<i32>} : memref<64x32xf32, #tpu.memory_space<vmem>>, vector<64x32xf32>,
    %c0_28 = arith.constant 0 : index
    %c0_29 = arith.constant 0 : index
    %36 = vector.load %arg10[%c0_28, %c0_29] : memref<32x32xf32, #tpu.memory_space<vmem>>, vector<32x32xf32>
    %cst_30 = arith.constant dense<0.000000e+00> : vector<64x32xf32>
    %37 = tpu.matmul %29, %36, %cst_30 {dimension_numbers = #tpu.dot_dimension_numbers<[1], [0], [0], [1], [0, 0, 1, 1], [], []>} : vector<64x32xf32>, vector<32x32xf32>, vector<64x32xf32> -> vector<64x32xf32>
    %c0_31 = arith.constant 0 : index
    %c0_32 = arith.constant 0 : index
    %38 = vector.load %arg17[%c0_31, %c0_32] : memref<64x32xf32, #tpu.memory_space<vmem>>, vector<64x32xf32>
    tpu.vector_store %arg17[%c0_31, %c0_32], %37 {strides = array<i32>} : memref<64x32xf32, #tpu.memory_space<vmem>>, vector<64x32xf32>,
    %c0_33 = arith.constant 0 : index
    %c0_34 = arith.constant 0 : index
    %39 = vector.load %arg6[%c0_33, %c0_34] : memref<1x32xf32, #tpu.memory_space<vmem>>, vector<1x32xf32>
    %c0_35 = arith.constant 0 : index
    %c0_36 = arith.constant 0 : index
    %40 = vector.load %arg7[%c0_35, %c0_36] : memref<1x32xf32, #tpu.memory_space<vmem>>, vector<1x32xf32>
    %c0_37 = arith.constant 0 : index
    %c0_38 = arith.constant 0 : index
    %41 = vector.load %arg15[%c0_37, %c0_38] : memref<64x32xf32, #tpu.memory_space<vmem>>, vector<64x32xf32>
    %42 = vector.broadcast %39 : vector<1x32xf32> to vector<64x32xf32>
    %43 = arith.addf %42, %41 : vector<64x32xf32>
    %44 = vector.broadcast %40 : vector<1x32xf32> to vector<64x32xf32>
    %45 = arith.maximumf %43, %44 : vector<64x32xf32>
    %46 = arith.subf %43, %45 : vector<64x32xf32>
    %47 = math.exp %46 : vector<64x32xf32>
    %c0_39 = arith.constant 0 : index
    %c0_40 = arith.constant 0 : index
    %48 = vector.load %arg16[%c0_39, %c0_40] : memref<64x32xf32, #tpu.memory_space<vmem>>, vector<64x32xf32>
    %49 = arith.mulf %47, %48 : vector<64x32xf32>
    %c0_41 = arith.constant 0 : index
    %c0_42 = arith.constant 0 : index
    %50 = vector.load %arg16[%c0_41, %c0_42] : memref<64x32xf32, #tpu.memory_space<vmem>>, vector<64x32xf32>
    tpu.vector_store %arg16[%c0_41, %c0_42], %49 {strides = array<i32>} : memref<64x32xf32, #tpu.memory_space<vmem>>, vector<64x32xf32>,
    %c0_43 = arith.constant 0 : index
    %c0_44 = arith.constant 0 : index
    %51 = vector.load %arg14[%c0_43, %c0_44] : memref<64x32xf32, #tpu.memory_space<vmem>>, vector<64x32xf32>
    tpu.vector_store %arg14[%c0_43, %c0_44], %47 {strides = array<i32>} : memref<64x32xf32, #tpu.memory_space<vmem>>, vector<64x32xf32>,
    %cst_45 = arith.constant 0.000000e+00 : f32
    %52 = vector.broadcast %cst_45 : f32 to vector<1x32xf32>
    %53 = arith.subf %52, %40 : vector<1x32xf32>
    %54 = vector.broadcast %53 : vector<1x32xf32> to vector<64x32xf32>
    %55 = arith.subf %54, %45 : vector<64x32xf32>
    %56 = math.exp %55 : vector<64x32xf32>
    %c0_46 = arith.constant 0 : index
    %c0_47 = arith.constant 0 : index
    %57 = vector.load %arg15[%c0_46, %c0_47] : memref<64x32xf32, #tpu.memory_space<vmem>>, vector<64x32xf32>
    tpu.vector_store %arg15[%c0_46, %c0_47], %56 {strides = array<i32>} : memref<64x32xf32, #tpu.memory_space<vmem>>, vector<64x32xf32>,
    %c0_48 = arith.constant 0 : index
    %c0_49 = arith.constant 0 : index
    %58 = vector.load %arg20[%c0_48, %c0_49] : memref<8x32xf32, #tpu.memory_space<vmem>>, vector<8x32xf32>
    %c0_50 = arith.constant 0 : index
    %c0_51 = arith.constant 0 : index
    %59 = vector.load %arg21[%c0_50, %c0_51] : memref<8x32xf32, #tpu.memory_space<vmem>>, vector<8x32xf32>
    %c0_i32_52 = arith.constant 0 : i32
    %c8_i32 = arith.constant 8 : i32
    %60 = arith.muli %c0_i32_52, %c8_i32 : i32
    %61 = tpu.assume_multiple %60, 8 : i32
    %62 = arith.index_cast %61 : i32 to index
    %c0_53 = arith.constant 0 : index
    %63 = vector.load %arg15[%62, %c0_53] : memref<64x32xf32, #tpu.memory_space<vmem>>, vector<8x32xf32>
    %64 = arith.index_cast %61 : i32 to index
    %c0_54 = arith.constant 0 : index
    %65 = vector.load %arg14[%64, %c0_54] : memref<64x32xf32, #tpu.memory_space<vmem>>, vector<8x32xf32>
    %66 = arith.index_cast %61 : i32 to index
    %c0_55 = arith.constant 0 : index
    %67 = vector.load %arg16[%66, %c0_55] : memref<64x32xf32, #tpu.memory_space<vmem>>, vector<8x32xf32>
    %68 = arith.mulf %63, %58 : vector<8x32xf32>
    %69 = arith.addf %68, %67 : vector<8x32xf32>
    %70 = arith.mulf %63, %59 : vector<8x32xf32>
    %71 = arith.addf %70, %65 : vector<8x32xf32>
    %72 = arith.index_cast %61 : i32 to index
    %c0_56 = arith.constant 0 : index
    %73 = vector.load %arg18[%72, %c0_56] : memref<64x32xf32, #tpu.memory_space<vmem>>, vector<8x32xf32>
    tpu.vector_store %arg18[%72, %c0_56], %69 {strides = array<i32>} : memref<64x32xf32, #tpu.memory_space<vmem>>, vector<8x32xf32>,
    %74 = arith.index_cast %61 : i32 to index
    %c0_57 = arith.constant 0 : index
    %75 = vector.load %arg19[%74, %c0_57] : memref<64x32xf32, #tpu.memory_space<vmem>>, vector<8x32xf32>
    tpu.vector_store %arg19[%74, %c0_57], %71 {strides = array<i32>} : memref<64x32xf32, #tpu.memory_space<vmem>>, vector<8x32xf32>,
    %c1_i32 = arith.constant 1 : i32
    %c8_i32_58 = arith.constant 8 : i32
    %76 = arith.muli %c1_i32, %c8_i32_58 : i32
    %77 = tpu.assume_multiple %76, 8 : i32
    %78 = arith.index_cast %77 : i32 to index
    %c0_59 = arith.constant 0 : index
    %79 = vector.load %arg15[%78, %c0_59] : memref<64x32xf32, #tpu.memory_space<vmem>>, vector<8x32xf32>
    %80 = arith.index_cast %77 : i32 to index
    %c0_60 = arith.constant 0 : index
    %81 = vector.load %arg14[%80, %c0_60] : memref<64x32xf32, #tpu.memory_space<vmem>>, vector<8x32xf32>
    %82 = arith.index_cast %77 : i32 to index
    %c0_61 = arith.constant 0 : index
    %83 = vector.load %arg16[%82, %c0_61] : memref<64x32xf32, #tpu.memory_space<vmem>>, vector<8x32xf32>
    %84 = arith.mulf %79, %69 : vector<8x32xf32>
    %85 = arith.addf %84, %83 : vector<8x32xf32>
    %86 = arith.mulf %79, %71 : vector<8x32xf32>
    %87 = arith.addf %86, %81 : vector<8x32xf32>
    %88 = arith.index_cast %77 : i32 to index
    %c0_62 = arith.constant 0 : index
    %89 = vector.load %arg18[%88, %c0_62] : memref<64x32xf32, #tpu.memory_space<vmem>>, vector<8x32xf32>
    tpu.vector_store %arg18[%88, %c0_62], %85 {strides = array<i32>} : memref<64x32xf32, #tpu.memory_space<vmem>>, vector<8x32xf32>,
    %90 = arith.index_cast %77 : i32 to index
    %c0_63 = arith.constant 0 : index
    %91 = vector.load %arg19[%90, %c0_63] : memref<64x32xf32, #tpu.memory_space<vmem>>, vector<8x32xf32>
    tpu.vector_store %arg19[%90, %c0_63], %87 {strides = array<i32>} : memref<64x32xf32, #tpu.memory_space<vmem>>, vector<8x32xf32>,
    %c2_i32 = arith.constant 2 : i32
    %c8_i32_64 = arith.constant 8 : i32
    %92 = arith.muli %c2_i32, %c8_i32_64 : i32
    %93 = tpu.assume_multiple %92, 8 : i32
    %94 = arith.index_cast %93 : i32 to index
    %c0_65 = arith.constant 0 : index
    %95 = vector.load %arg15[%94, %c0_65] : memref<64x32xf32, #tpu.memory_space<vmem>>, vector<8x32xf32>
    %96 = arith.index_cast %93 : i32 to index
    %c0_66 = arith.constant 0 : index
    %97 = vector.load %arg14[%96, %c0_66] : memref<64x32xf32, #tpu.memory_space<vmem>>, vector<8x32xf32>
    %98 = arith.index_cast %93 : i32 to index
    %c0_67 = arith.constant 0 : index
    %99 = vector.load %arg16[%98, %c0_67] : memref<64x32xf32, #tpu.memory_space<vmem>>, vector<8x32xf32>
    %100 = arith.mulf %95, %85 : vector<8x32xf32>
    %101 = arith.addf %100, %99 : vector<8x32xf32>
    %102 = arith.mulf %95, %87 : vector<8x32xf32>
    %103 = arith.addf %102, %97 : vector<8x32xf32>
    %104 = arith.index_cast %93 : i32 to index
    %c0_68 = arith.constant 0 : index
    %105 = vector.load %arg18[%104, %c0_68] : memref<64x32xf32, #tpu.memory_space<vmem>>, vector<8x32xf32>
    tpu.vector_store %arg18[%104, %c0_68], %101 {strides = array<i32>} : memref<64x32xf32, #tpu.memory_space<vmem>>, vector<8x32xf32>,
    %106 = arith.index_cast %93 : i32 to index
    %c0_69 = arith.constant 0 : index
    %107 = vector.load %arg19[%106, %c0_69] : memref<64x32xf32, #tpu.memory_space<vmem>>, vector<8x32xf32>
    tpu.vector_store %arg19[%106, %c0_69], %103 {strides = array<i32>} : memref<64x32xf32, #tpu.memory_space<vmem>>, vector<8x32xf32>,
    %c3_i32 = arith.constant 3 : i32
    %c8_i32_70 = arith.constant 8 : i32
    %108 = arith.muli %c3_i32, %c8_i32_70 : i32
    %109 = tpu.assume_multiple %108, 8 : i32
    %110 = arith.index_cast %109 : i32 to index
    %c0_71 = arith.constant 0 : index
    %111 = vector.load %arg15[%110, %c0_71] : memref<64x32xf32, #tpu.memory_space<vmem>>, vector<8x32xf32>
    %112 = arith.index_cast %109 : i32 to index
    %c0_72 = arith.constant 0 : index
    %113 = vector.load %arg14[%112, %c0_72] : memref<64x32xf32, #tpu.memory_space<vmem>>, vector<8x32xf32>
    %114 = arith.index_cast %109 : i32 to index
    %c0_73 = arith.constant 0 : index
    %115 = vector.load %arg16[%114, %c0_73] : memref<64x32xf32, #tpu.memory_space<vmem>>, vector<8x32xf32>
    %116 = arith.mulf %111, %101 : vector<8x32xf32>
    %117 = arith.addf %116, %115 : vector<8x32xf32>
    %118 = arith.mulf %111, %103 : vector<8x32xf32>
    %119 = arith.addf %118, %113 : vector<8x32xf32>
    %120 = arith.index_cast %109 : i32 to index
    %c0_74 = arith.constant 0 : index
    %121 = vector.load %arg18[%120, %c0_74] : memref<64x32xf32, #tpu.memory_space<vmem>>, vector<8x32xf32>
    tpu.vector_store %arg18[%120, %c0_74], %117 {strides = array<i32>} : memref<64x32xf32, #tpu.memory_space<vmem>>, vector<8x32xf32>,
    %122 = arith.index_cast %109 : i32 to index
    %c0_75 = arith.constant 0 : index
    %123 = vector.load %arg19[%122, %c0_75] : memref<64x32xf32, #tpu.memory_space<vmem>>, vector<8x32xf32>
    tpu.vector_store %arg19[%122, %c0_75], %119 {strides = array<i32>} : memref<64x32xf32, #tpu.memory_space<vmem>>, vector<8x32xf32>,
    %c4_i32 = arith.constant 4 : i32
    %c8_i32_76 = arith.constant 8 : i32
    %124 = arith.muli %c4_i32, %c8_i32_76 : i32
    %125 = tpu.assume_multiple %124, 8 : i32
    %126 = arith.index_cast %125 : i32 to index
    %c0_77 = arith.constant 0 : index
    %127 = vector.load %arg15[%126, %c0_77] : memref<64x32xf32, #tpu.memory_space<vmem>>, vector<8x32xf32>
    %128 = arith.index_cast %125 : i32 to index
    %c0_78 = arith.constant 0 : index
    %129 = vector.load %arg14[%128, %c0_78] : memref<64x32xf32, #tpu.memory_space<vmem>>, vector<8x32xf32>
    %130 = arith.index_cast %125 : i32 to index
    %c0_79 = arith.constant 0 : index
    %131 = vector.load %arg16[%130, %c0_79] : memref<64x32xf32, #tpu.memory_space<vmem>>, vector<8x32xf32>
    %132 = arith.mulf %127, %117 : vector<8x32xf32>
    %133 = arith.addf %132, %131 : vector<8x32xf32>
    %134 = arith.mulf %127, %119 : vector<8x32xf32>
    %135 = arith.addf %134, %129 : vector<8x32xf32>
    %136 = arith.index_cast %125 : i32 to index
    %c0_80 = arith.constant 0 : index
    %137 = vector.load %arg18[%136, %c0_80] : memref<64x32xf32, #tpu.memory_space<vmem>>, vector<8x32xf32>
    tpu.vector_store %arg18[%136, %c0_80], %133 {strides = array<i32>} : memref<64x32xf32, #tpu.memory_space<vmem>>, vector<8x32xf32>,
    %138 = arith.index_cast %125 : i32 to index
    %c0_81 = arith.constant 0 : index
    %139 = vector.load %arg19[%138, %c0_81] : memref<64x32xf32, #tpu.memory_space<vmem>>, vector<8x32xf32>
    tpu.vector_store %arg19[%138, %c0_81], %135 {strides = array<i32>} : memref<64x32xf32, #tpu.memory_space<vmem>>, vector<8x32xf32>,
    %c5_i32 = arith.constant 5 : i32
    %c8_i32_82 = arith.constant 8 : i32
    %140 = arith.muli %c5_i32, %c8_i32_82 : i32
    %141 = tpu.assume_multiple %140, 8 : i32
    %142 = arith.index_cast %141 : i32 to index
    %c0_83 = arith.constant 0 : index
    %143 = vector.load %arg15[%142, %c0_83] : memref<64x32xf32, #tpu.memory_space<vmem>>, vector<8x32xf32>
    %144 = arith.index_cast %141 : i32 to index
    %c0_84 = arith.constant 0 : index
    %145 = vector.load %arg14[%144, %c0_84] : memref<64x32xf32, #tpu.memory_space<vmem>>, vector<8x32xf32>
    %146 = arith.index_cast %141 : i32 to index
    %c0_85 = arith.constant 0 : index
    %147 = vector.load %arg16[%146, %c0_85] : memref<64x32xf32, #tpu.memory_space<vmem>>, vector<8x32xf32>
    %148 = arith.mulf %143, %133 : vector<8x32xf32>
    %149 = arith.addf %148, %147 : vector<8x32xf32>
    %150 = arith.mulf %143, %135 : vector<8x32xf32>
    %151 = arith.addf %150, %145 : vector<8x32xf32>
    %152 = arith.index_cast %141 : i32 to index
    %c0_86 = arith.constant 0 : index
    %153 = vector.load %arg18[%152, %c0_86] : memref<64x32xf32, #tpu.memory_space<vmem>>, vector<8x32xf32>
    tpu.vector_store %arg18[%152, %c0_86], %149 {strides = array<i32>} : memref<64x32xf32, #tpu.memory_space<vmem>>, vector<8x32xf32>,
    %154 = arith.index_cast %141 : i32 to index
    %c0_87 = arith.constant 0 : index
    %155 = vector.load %arg19[%154, %c0_87] : memref<64x32xf32, #tpu.memory_space<vmem>>, vector<8x32xf32>
    tpu.vector_store %arg19[%154, %c0_87], %151 {strides = array<i32>} : memref<64x32xf32, #tpu.memory_space<vmem>>, vector<8x32xf32>,
    %c6_i32 = arith.constant 6 : i32
    %c8_i32_88 = arith.constant 8 : i32
    %156 = arith.muli %c6_i32, %c8_i32_88 : i32
    %157 = tpu.assume_multiple %156, 8 : i32
    %158 = arith.index_cast %157 : i32 to index
    %c0_89 = arith.constant 0 : index
    %159 = vector.load %arg15[%158, %c0_89] : memref<64x32xf32, #tpu.memory_space<vmem>>, vector<8x32xf32>
    %160 = arith.index_cast %157 : i32 to index
    %c0_90 = arith.constant 0 : index
    %161 = vector.load %arg14[%160, %c0_90] : memref<64x32xf32, #tpu.memory_space<vmem>>, vector<8x32xf32>
    %162 = arith.index_cast %157 : i32 to index
    %c0_91 = arith.constant 0 : index
    %163 = vector.load %arg16[%162, %c0_91] : memref<64x32xf32, #tpu.memory_space<vmem>>, vector<8x32xf32>
    %164 = arith.mulf %159, %149 : vector<8x32xf32>
    %165 = arith.addf %164, %163 : vector<8x32xf32>
    %166 = arith.mulf %159, %151 : vector<8x32xf32>
    %167 = arith.addf %166, %161 : vector<8x32xf32>
    %168 = arith.index_cast %157 : i32 to index
    %c0_92 = arith.constant 0 : index
    %169 = vector.load %arg18[%168, %c0_92] : memref<64x32xf32, #tpu.memory_space<vmem>>, vector<8x32xf32>
    tpu.vector_store %arg18[%168, %c0_92], %165 {strides = array<i32>} : memref<64x32xf32, #tpu.memory_space<vmem>>, vector<8x32xf32>,
    %170 = arith.index_cast %157 : i32 to index
    %c0_93 = arith.constant 0 : index
    %171 = vector.load %arg19[%170, %c0_93] : memref<64x32xf32, #tpu.memory_space<vmem>>, vector<8x32xf32>
    tpu.vector_store %arg19[%170, %c0_93], %167 {strides = array<i32>} : memref<64x32xf32, #tpu.memory_space<vmem>>, vector<8x32xf32>,
    %c7_i32 = arith.constant 7 : i32
    %c8_i32_94 = arith.constant 8 : i32
    %172 = arith.muli %c7_i32, %c8_i32_94 : i32
    %173 = tpu.assume_multiple %172, 8 : i32
    %174 = arith.index_cast %173 : i32 to index
    %c0_95 = arith.constant 0 : index
    %175 = vector.load %arg15[%174, %c0_95] : memref<64x32xf32, #tpu.memory_space<vmem>>, vector<8x32xf32>
    %176 = arith.index_cast %173 : i32 to index
    %c0_96 = arith.constant 0 : index
    %177 = vector.load %arg14[%176, %c0_96] : memref<64x32xf32, #tpu.memory_space<vmem>>, vector<8x32xf32>
    %178 = arith.index_cast %173 : i32 to index
    %c0_97 = arith.constant 0 : index
    %179 = vector.load %arg16[%178, %c0_97] : memref<64x32xf32, #tpu.memory_space<vmem>>, vector<8x32xf32>
    %180 = arith.mulf %175, %165 : vector<8x32xf32>
    %181 = arith.addf %180, %179 : vector<8x32xf32>
    %182 = arith.mulf %175, %167 : vector<8x32xf32>
    %183 = arith.addf %182, %177 : vector<8x32xf32>
    %184 = arith.index_cast %173 : i32 to index
    %c0_98 = arith.constant 0 : index
    %185 = vector.load %arg18[%184, %c0_98] : memref<64x32xf32, #tpu.memory_space<vmem>>, vector<8x32xf32>
    tpu.vector_store %arg18[%184, %c0_98], %181 {strides = array<i32>} : memref<64x32xf32, #tpu.memory_space<vmem>>, vector<8x32xf32>,
    %186 = arith.index_cast %173 : i32 to index
    %c0_99 = arith.constant 0 : index
    %187 = vector.load %arg19[%186, %c0_99] : memref<64x32xf32, #tpu.memory_space<vmem>>, vector<8x32xf32>
    tpu.vector_store %arg19[%186, %c0_99], %183 {strides = array<i32>} : memref<64x32xf32, #tpu.memory_space<vmem>>, vector<8x32xf32>,
    %c8_i32_100 = arith.constant 8 : i32
    %c0_101 = arith.constant 0 : index
    %c0_102 = arith.constant 0 : index
    %188 = vector.load %arg20[%c0_101, %c0_102] : memref<8x32xf32, #tpu.memory_space<vmem>>, vector<8x32xf32>
    tpu.vector_store %arg20[%c0_101, %c0_102], %181 {strides = array<i32>} : memref<8x32xf32, #tpu.memory_space<vmem>>, vector<8x32xf32>,
    %c0_103 = arith.constant 0 : index
    %c0_104 = arith.constant 0 : index
    %189 = vector.load %arg21[%c0_103, %c0_104] : memref<8x32xf32, #tpu.memory_space<vmem>>, vector<8x32xf32>
    tpu.vector_store %arg21[%c0_103, %c0_104], %183 {strides = array<i32>} : memref<8x32xf32, #tpu.memory_space<vmem>>, vector<8x32xf32>,
    %c0_105 = arith.constant 0 : index
    %c0_106 = arith.constant 0 : index
    %190 = vector.load %arg18[%c0_105, %c0_106] : memref<64x32xf32, #tpu.memory_space<vmem>>, vector<64x32xf32>
    %c0_107 = arith.constant 0 : index
    %c0_108 = arith.constant 0 : index
    %191 = vector.load %arg19[%c0_107, %c0_108] : memref<64x32xf32, #tpu.memory_space<vmem>>, vector<64x32xf32>
    %192 = arith.divf %190, %191 : vector<64x32xf32>
    %c0_109 = arith.constant 0 : index
    %c0_110 = arith.constant 0 : index
    %193 = vector.load %arg17[%c0_109, %c0_110] : memref<64x32xf32, #tpu.memory_space<vmem>>, vector<64x32xf32>
    %194 = arith.mulf %192, %193 : vector<64x32xf32>
    %c0_111 = arith.constant 0 : index
    %c0_112 = arith.constant 0 : index
    %195 = vector.load %arg11[%c0_111, %c0_112] : memref<32x32xf32, #tpu.memory_space<vmem>>, vector<32x32xf32>
    %cst_113 = arith.constant dense<0.000000e+00> : vector<64x32xf32>
    %196 = tpu.matmul %194, %195, %cst_113 {dimension_numbers = #tpu.dot_dimension_numbers<[1], [0], [0], [1], [0, 0, 1, 1], [], []>} : vector<64x32xf32>, vector<32x32xf32>, vector<64x32xf32> -> vector<64x32xf32>
    %c0_114 = arith.constant 0 : index
    %c0_115 = arith.constant 0 : index
    %197 = vector.load %arg12[%c0_114, %c0_115] : memref<1x32xf32, #tpu.memory_space<vmem>>, vector<1x32xf32>
    %198 = vector.broadcast %197 : vector<1x32xf32> to vector<64x32xf32>
    %199 = arith.addf %196, %198 : vector<64x32xf32>
    %c0_116 = arith.constant 0 : index
    %c0_117 = arith.constant 0 : index
    %c0_118 = arith.constant 0 : index
    %200 = vector.load %arg13[%c0_116, %c0_117, %c0_118] : memref<1x64x32xf32, #tpu.memory_space<vmem>>, vector<1x64x32xf32>
    %201 = vector.shape_cast %200 : vector<1x64x32xf32> to vector<64x32xf32>
    %202 = vector.shape_cast %199 : vector<64x32xf32> to vector<1x64x32xf32>
    tpu.vector_store %arg13[%c0_116, %c0_117, %c0_118], %202 {strides = array<i32>} : memref<1x64x32xf32, #tpu.memory_space<vmem>>, vector<1x64x32xf32>,
    return
  }
  func.func @transform_0(%arg0: i32, %arg1: i32) -> (i32, i32, i32) {
    %c0_i32 = arith.constant 0 : i32
    %c0_i32_0 = arith.constant 0 : i32
    return %arg0, %arg1, %c0_i32 : i32, i32, i32
  }
  func.func @transform_1(%arg0: i32, %arg1: i32) -> (i32, i32) {
    %c0_i32 = arith.constant 0 : i32
    %c0_i32_0 = arith.constant 0 : i32
    %c0_i32_1 = arith.constant 0 : i32
    return %c0_i32, %c0_i32_0 : i32, i32
  }
  func.func @transform_2(%arg0: i32, %arg1: i32) -> (i32, i32) {
    %c0_i32 = arith.constant 0 : i32
    %c0_i32_0 = arith.constant 0 : i32
    %c0_i32_1 = arith.constant 0 : i32
    return %c0_i32, %c0_i32_0 : i32, i32
  }
  func.func @transform_3(%arg0: i32, %arg1: i32) -> (i32, i32) {
    %c0_i32 = arith.constant 0 : i32
    %c0_i32_0 = arith.constant 0 : i32
    %c0_i32_1 = arith.constant 0 : i32
    return %c0_i32, %c0_i32_0 : i32, i32
  }
  func.func @transform_4(%arg0: i32, %arg1: i32) -> (i32, i32) {
    %c0_i32 = arith.constant 0 : i32
    %c0_i32_0 = arith.constant 0 : i32
    %c0_i32_1 = arith.constant 0 : i32
    return %c0_i32, %c0_i32_0 : i32, i32
  }
  func.func @transform_5(%arg0: i32, %arg1: i32) -> (i32, i32) {
    %c0_i32 = arith.constant 0 : i32
    %c0_i32_0 = arith.constant 0 : i32
    %c0_i32_1 = arith.constant 0 : i32
    return %c0_i32, %c0_i32_0 : i32, i32
  }
  func.func @transform_6(%arg0: i32, %arg1: i32) -> (i32, i32) {
    %c0_i32 = arith.constant 0 : i32
    %c0_i32_0 = arith.constant 0 : i32
    %c0_i32_1 = arith.constant 0 : i32
    return %c0_i32, %c0_i32_0 : i32, i32
  }
  func.func @transform_7(%arg0: i32, %arg1: i32) -> (i32, i32) {
    %c0_i32 = arith.constant 0 : i32
    %c0_i32_0 = arith.constant 0 : i32
    %c0_i32_1 = arith.constant 0 : i32
    return %c0_i32, %c0_i32_0 : i32, i32
  }
  func.func @transform_8(%arg0: i32, %arg1: i32) -> (i32, i32) {
    %c0_i32 = arith.constant 0 : i32
    %c0_i32_0 = arith.constant 0 : i32
    %c0_i32_1 = arith.constant 0 : i32
    return %c0_i32, %c0_i32_0 : i32, i32
  }
  func.func @transform_9(%arg0: i32, %arg1: i32) -> (i32, i32) {
    %c0_i32 = arith.constant 0 : i32
    %c0_i32_0 = arith.constant 0 : i32
    %c0_i32_1 = arith.constant 0 : i32
    return %c0_i32, %c0_i32_0 : i32, i32
  }
  func.func @transform_10(%arg0: i32, %arg1: i32) -> (i32, i32) {
    %c0_i32 = arith.constant 0 : i32
    %c0_i32_0 = arith.constant 0 : i32
    %c0_i32_1 = arith.constant 0 : i32
    return %c0_i32, %c0_i32_0 : i32, i32
  }
  func.func @transform_11(%arg0: i32, %arg1: i32) -> (i32, i32, i32) {
    %c0_i32 = arith.constant 0 : i32
    %c0_i32_0 = arith.constant 0 : i32
    return %arg0, %arg1, %c0_i32 : i32, i32, i32
  }
}

</mosaic_0001>

<bundles_post_ra>
// kernel: tpu_custom_call.1
= control target key start
LH: loop header
LB: loop body
LE: loop exit
PB: predicated region body
PF: predicated region fallthrough
CT: control target
= control target key end

     0   :  { %16 = vsyncpa [#allocation12], 0  ;;  %s1882_s0 = inlined_call_operand.vmem [shape: f32[1,64,32], index: 0, kind: input, shape index: {}]   ;;  %s1883_s1 = inlined_call_operand.vmem [shape: f32[1,32], index: 1, kind: input, shape index: {}]   ;;  %s1884_s2 = inlined_call_operand.vmem [shape: f32[1,32], index: 2, kind: input, shape index: {}]   ;;  %s1885_s3 = inlined_call_operand.hbm [shape: f32[1,32], index: 3, kind: input, shape index: {}]   ;;  %s1886_s4 = inlined_call_operand.hbm [shape: f32[1,32], index: 4, kind: input, shape index: {}]   ;;  %s1887_s5 = inlined_call_operand.hbm [shape: f32[1,32], index: 5, kind: input, shape index: {}]   ;;  %s1888_s6 = inlined_call_operand.vmem [shape: f32[32,32], index: 6, kind: input, shape index: {}]   ;;  %s1889_s7 = inlined_call_operand.vmem [shape: f32[32,32], index: 7, kind: input, shape index: {}]   ;;  %s1890_s8 = inlined_call_operand.vmem [shape: f32[32,32], index: 8, kind: input, shape index: {}]   ;;  %s1891_s9 = inlined_call_operand.vmem [shape: f32[32,32], index: 9, kind: input, shape index: {}]   ;;  %s1892_s10 = inlined_call_operand.vmem [shape: f32[1,32], index: 10, kind: input, shape index: {}]   ;;  %s1893_s11 = inlined_call_operand.vmem [shape: f32[1,64,32], index: 11, kind: output, shape index: {}]  }
   0x1   :  { %17 = vsyncpa [#allocation14], 0  ;;  %s1461_s17 = smov [#allocation13]   ;;  %s1462_s19 = smov [#allocation11]  }
   0x2   :  { %s40_s18 = sshll.u32 %s1461_s17, 4  ;;  %s30_s20 = sshll.u32 %s1462_s19, 4  ;;  %s41_s18 = int_to_ptr.vmem [resolvable:$true] %s40_s18  ;;  %s31_s20 = int_to_ptr.vmem [resolvable:$true] %s30_s20 }
   0x3   :  { %s1391_s23 = scalar_lea.hbm %s1886_s4, 16 }
   0x4   :  { %p1392_p0 = scmp.ne.s32.totalorder %s1886_s4, %s1391_s23  ;;  %p1395_p1 = scmp.lt.u32.totalorder %s1391_s23, %s1886_s4 }
   0x6   :  { %p1397_p2 = pnand %p1395_p1, %p1392_p0 }
   0x8   :  { %1400 = shalt.err (!%p1397_p2)
}
   0x9   :  { %s1401_s28 = scalar_lea.vmem %s41_s18, 16  ;;  %s1405_s29 = scalar_lea.vmem %s41_s18, 32 }
   0xa   :  { %p1402_p3 = scmp.ne.s32.totalorder %s41_s18, %s1401_s28  ;;  %p1406_p4 = scmp.lt.s32.totalorder %s41_s18, %s41_s18 }
   0xb   :  { %p1407_p5 = scmp.lt.s32.totalorder %s1405_s29, %s1401_s28 }
   0xd   :  { %p1408_p6 = por %p1407_p5, %p1406_p4 }
   0xf   :  { %p1409_p7 = pnand %p1408_p6, %p1402_p3 }
  0x11   :  { %1412 = shalt.err (!%p1409_p7)
}
  0x12   :  { %43 = dma.hbm_to_vmem [thread:$0]  %s1886_s4, 16, %s41_s18, [#allocation14]  }
  0x13   :  { %s1413_s15 = scalar_lea.hbm %s1885_s3, 16 }
  0x14   :  { %p1414_p8 = scmp.ne.s32.totalorder %s1885_s3, %s1413_s15  ;;  %p1417_p9 = scmp.lt.u32.totalorder %s1413_s15, %s1885_s3 }
  0x16   :  { %p1419_p10 = pnand %p1417_p9, %p1414_p8 }
  0x18   :  { %1422 = shalt.err (!%p1419_p10)
}
  0x19   :  { %s1423_s22 = scalar_lea.vmem %s31_s20, 16  ;;  %s1427_s23 = scalar_lea.vmem %s31_s20, 32 }
  0x1a   :  { %p1424_p11 = scmp.ne.s32.totalorder %s31_s20, %s1423_s22  ;;  %p1428_p12 = scmp.lt.s32.totalorder %s31_s20, %s31_s20 }
  0x1b   :  { %p1429_p13 = scmp.lt.s32.totalorder %s1427_s23, %s1423_s22 }
  0x1d   :  { %p1430_p0 = por %p1429_p13, %p1428_p12 }
  0x1f   :  { %p1431_p1 = pnand %p1430_p0, %p1424_p11 }
  0x21   :  { %1434 = shalt.err (!%p1431_p1)
}
  0x22   :  { %33 = dma.hbm_to_vmem [thread:$0]  %s1885_s3, 16, %s31_s20, [#allocation12]  }
  0x23   :  { %s1463_s24 = smov [#allocation15]   ;;  %s1435_s28 = scalar_lea.hbm %s1887_s5, 16 }
  0x24   :  { %s50_s25 = sshll.u32 %s1463_s24, 4  ;;  %p1436_p2 = scmp.ne.s32.totalorder %s1887_s5, %s1435_s28  ;;  %s51_s25 = int_to_ptr.vmem [resolvable:$true] %s50_s25 }
  0x25   :  { %p1439_p3 = scmp.lt.u32.totalorder %s1435_s28, %s1887_s5 }
  0x27   :  { %p1441_p4 = pnand %p1439_p3, %p1436_p2 }
  0x29   :  { %1444 = shalt.err (!%p1441_p4)
}
  0x2a   :  { %s1445_s14 = scalar_lea.vmem %s51_s25, 16  ;;  %s1449_s3 = scalar_lea.vmem %s51_s25, 32 }
  0x2b   :  { %p1446_p5 = scmp.ne.s32.totalorder %s51_s25, %s1445_s14  ;;  %p1450_p6 = scmp.lt.s32.totalorder %s51_s25, %s51_s25 }
  0x2c   :  { %p1451_p7 = scmp.lt.s32.totalorder %s1449_s3, %s1445_s14 }
  0x2e   :  { %p1452_p8 = por %p1451_p7, %p1450_p6 }
  0x30   :  { %p1453_p9 = pnand %p1452_p8, %p1446_p5 }
  0x32   :  { %1456 = shalt.err (!%p1453_p9)
}
  0x33   :  { %53 = dma.hbm_to_vmem [thread:$0]  %s1887_s5, 16, %s51_s25, [#allocation14]  }
  0x34   :  { %1457 = dma.done.wait [#allocation12], 16  }
  0x35   :  { %1458 = vsyncadd [#allocation12], 4294967280 }
  0x36   :  { %1459 = dma.done.wait [#allocation14], 32  }
  0x37   :  { %1460 = vsyncadd [#allocation14], 4294967264  ;;  %vm77_vm0 = vcmask 261120   ;;  %v1464_v0 = vmov 0.0   ;;  %v233_v1 = vld [vmem:[%s1888_s6] sm:$0xff]  ;;  %v234_v2 = vld [vmem:[%s1888_s6 + $0x8] sm:$0xff] }
  0x38   :  { %80 = vst.msk [vmem:[#allocation10] sm:$0xff] %vm77_vm0, %v1464_v0  ;;  %78 = vst.msk [vmem:[#allocation8] sm:$0xff] %vm77_vm0, %v1464_v0  ;;  %v235_v3 = vld [vmem:[%s1888_s6 + $0x10] sm:$0xff]  ;;  %v1275_v4 = vpack.c.bf16 %v234_v2, %v233_v1  ;;  %v236_v5 = vld [vmem:[%s1888_s6 + $0x18] sm:$0xff] }
  0x39   :  { %79 = vst.msk [vmem:[#allocation9] sm:$0xff] %vm77_vm0, %v1464_v0  ;;  %v81_v6 = vld [vmem:[%s1882_s0] sm:$0xff]  ;;  %v1279_v8 = vpack.c.bf16 %v236_v5, %v235_v3  ;;  %v82_v9 = vld [vmem:[%s1882_s0 + $0x8] sm:$0xff]  ;;  %v83_v10 = vld [vmem:[%s1882_s0 + $0x10] sm:$0xff] }
  0x3a   :  { %92 = vst.msk [vmem:[#allocation2 + $0x8] sm:$0xff] %vm77_vm0, %v81_v6  ;;  %1276 = vmatprep.subr.bf16.mxu0 %v1275_v4  ;;  %93 = vst.msk [vmem:[#allocation2 + $0x10] sm:$0xff] %vm77_vm0, %v82_v9  ;;  %v84_v11 = vld [vmem:[%s1882_s0 + $0x18] sm:$0xff]  ;;  %v374_v12 = vld [vmem:[%s1889_s7] sm:$0xff] }
  0x3b   :  { %1278 = vmatpush3.bf16.msra.mxu0 %v1275_v4  ;;  %94 = vst.msk [vmem:[#allocation2 + $0x18] sm:$0xff] %vm77_vm0, %v83_v10  ;;  %95 = vst.msk [vmem:[#allocation2 + $0x20] sm:$0xff] %vm77_vm0, %v84_v11  ;;  %v375_v13 = vld [vmem:[%s1889_s7 + $0x8] sm:$0xff]  ;;  %v85_v14 = vld [vmem:[%s1882_s0 + $0x20] sm:$0xff] }
  0x3c   :  { %v86_v15 = vld [vmem:[%s1882_s0 + $0x28] sm:$0xff]  ;;  %1280 = vmatprep.subr.bf16.mxu0 %v1279_v8  ;;  %v1283_v16 = vpack.c.bf16 %v375_v13, %v374_v12  ;;  %96 = vst.msk [vmem:[#allocation2 + $0x28] sm:$0xff] %vm77_vm0, %v85_v14  ;;  %v376_v17 = vld [vmem:[%s1889_s7 + $0x10] sm:$0xff]  ;;  %v377_v18 = vld [vmem:[%s1889_s7 + $0x18] sm:$0xff] }
  0x3d   :  { %97 = vst.msk [vmem:[#allocation2 + $0x30] sm:$0xff] %vm77_vm0, %v86_v15  ;;  %v1287_v19 = vpack.c.bf16 %v377_v18, %v376_v17  ;;  %v1616_v20 = vld [vmem:[%s1882_s0 + $0x30] sm:$0xff]  ;;  %v1621_v21 = vld [vmem:[%s1882_s0 + $0x38] sm:$0xff]  ;;  %v515_v22 = vld [vmem:[%s1890_s8] sm:$0xff] }
  0x3e   :  { %1284 = vmatprep.subr.bf16.mxu1 %v1283_v16  ;;  %98 = vst.msk [vmem:[#allocation2 + $0x38] sm:$0xff] %vm77_vm0, %v1616_v20  ;;  %v516_v23 = vld [vmem:[%s1890_s8 + $0x8] sm:$0xff]  ;;  %v1636_v24 = vld [vmem:[%s1883_s1] ss:$0 sm:$0xff]  ;;  %v517_v26 = vld [vmem:[%s1890_s8 + $0x10] sm:$0xff] }
  0x3f   :  { %v89_v7 = vld [vmem:[#allocation10] sm:$0xff]  ;;  %1282 = vmatpush3.bf16.msra.mxu0 %v1279_v8  ;;  %1286 = vmatpush3.bf16.msra.mxu1 %v1283_v16  ;;  %v1291_v25 = vpack.c.bf16 %v516_v23, %v515_v22  ;;  %v518_v27 = vld [vmem:[%s1890_s8 + $0x18] sm:$0xff]  ;;  %v1675_v55 = vld [vmem:[%s1884_s2] ss:$0 sm:$0xff] }
  0x40   :  { %91 = vst.msk [vmem:[#allocation2] sm:$0xff] %vm77_vm0, %v89_v7  ;;  %99 = vst.msk [vmem:[#allocation10] sm:$0xff] %vm77_vm0, %v1621_v21  ;;  %v1644_v29 = vld [vmem:[#allocation11] ss:$0 sm:$0xff]  ;;  %1288 = vmatprep.subr.bf16.mxu1 %v1287_v19  ;;  %v1295_v37 = vpack.c.bf16 %v518_v27, %v517_v26 }
  0x41   :  { %v1646_v30 = vld [vmem:[#allocation2 + $0x8] sm:$0xff]  ;;  %v1649_v33 = vld [vmem:[#allocation2 + $0x10] sm:$0xff]  ;;  %1292 = vmatprep.subr.bf16.mxu0 %v1291_v25 }
  0x42   :  { %v109_v32 = vsub.f32 %v82_v9, %v1646_v30  ;;  %v110_v34 = vsub.f32 %v83_v10, %v1649_v33  ;;  %v1652_v35 = vld [vmem:[#allocation2 + $0x18] sm:$0xff]  ;;  %v1654_v36 = vld [vmem:[#allocation2 + $0x20] sm:$0xff] }
  0x43   :  { %1290 = vmatpush3.bf16.msra.mxu1 %v1287_v19  ;;  %v111_v44 = vsub.f32 %v84_v11, %v1652_v35  ;;  %v112_v45 = vsub.f32 %v85_v14, %v1654_v36  ;;  %v1666_v50 = vld [vmem:[#allocation2 + $0x28] sm:$0xff] }
  0x44   :  { %v124_v40 = vmul.f32 %v1636_v24, %v109_v32  ;;  %v170_v41 = vmul.f32 %v1644_v29, %v109_v32  ;;  %v125_v42 = vmul.f32 %v1636_v24, %v110_v34  ;;  %v171_v43 = vmul.f32 %v1644_v29, %v110_v34  ;;  %v106_v3 = vld [vmem:[#allocation2 + $0x30] sm:$0xff] }
  0x45   :  { %v126_v53 = vmul.f32 %v1636_v24, %v111_v44  ;;  %v172_v54 = vmul.f32 %v1644_v29, %v111_v44  ;;  %v127_v58 = vmul.f32 %v1636_v24, %v112_v45  ;;  %v173_v59 = vmul.f32 %v1644_v29, %v112_v45  ;;  %v107_v7 = vld [vmem:[#allocation2 + $0x38] sm:$0xff] }
  0x46   :  { %v132_v48 = vadd.f32 %v124_v40, %v1646_v30  ;;  %v178_v49 = vadd.f32 %v170_v41, %v1646_v30  ;;  %v133_v51 = vadd.f32 %v125_v42, %v1649_v33  ;;  %v179_v52 = vadd.f32 %v171_v43, %v1649_v33 }
  0x47   :  { %v100_v28 = vld [vmem:[#allocation2] sm:$0xff]  ;;  %v134_v61 = vadd.f32 %v126_v53, %v1652_v35  ;;  %v180_v62 = vadd.f32 %v172_v54, %v1652_v35  ;;  %v113_v63 = vsub.f32 %v86_v15, %v1666_v50  ;;  %v135_v0 = vadd.f32 %v127_v58, %v1654_v36 }
  0x48   :  { %v108_v31 = vsub.f32 %v81_v6, %v100_v28  ;;  %v1106_v57 = vmul.f32 -1.442695, %v178_v49  ;;  %v1107_v60 = vmul.f32 -1.442695, %v179_v52  ;;  %v181_v1 = vadd.f32 %v173_v59, %v1654_v36 }
  0x49   :  { %v1108_v4 = vmul.f32 -1.442695, %v180_v62  ;;  %v128_v5 = vmul.f32 %v1636_v24, %v113_v63  ;;  %v174_v6 = vmul.f32 %v1644_v29, %v113_v63  ;;  %v147_v10 = vmul.f32 %v1675_v55, %v109_v32 }
  0x4a   :  { %v123_v38 = vmul.f32 %v1636_v24, %v108_v31  ;;  %v169_v39 = vmul.f32 %v1644_v29, %v108_v31  ;;  %v146_v2 = vmul.f32 %v1675_v55, %v108_v31  ;;  %v1109_v8 = vmul.f32 -1.442695, %v181_v1 }
  0x4b   :  { %v136_v11 = vadd.f32 %v128_v5, %v1666_v50  ;;  %v182_v12 = vadd.f32 %v174_v6, %v1666_v50  ;;  %v114_v13 = vsub.f32 %v1616_v20, %v106_v3  ;;  %v155_v14 = vadd.f32 %v147_v10, %v1646_v30 }
  0x4c   :  { %v131_v46 = vadd.f32 %v123_v38, %v100_v28  ;;  %v177_v47 = vadd.f32 %v169_v39, %v100_v28  ;;  %v154_v9 = vadd.f32 %v146_v2, %v100_v28  ;;  %v115_v15 = vsub.f32 %v1621_v21, %v107_v7  ;;  %v950_v2 = vld [vmem:[%s1891_s9 + $0x10] sm:$0xff] }
  0x4d   :  { %v148_v16 = vmul.f32 %v1675_v55, %v110_v34  ;;  %v1110_v17 = vmul.f32 -1.442695, %v182_v12  ;;  %v129_v18 = vmul.f32 %v1636_v24, %v114_v13  ;;  %v175_v19 = vmul.f32 %v1644_v29, %v114_v13 }
  0x4e   :  { %v1105_v56 = vmul.f32 -1.442695, %v177_v47  ;;  %1203 = vmatprep.mubr.msk.f32.mxu0 %vm77_vm0, %v131_v46  ;;  %1223 = vmatprep.mubr.msk.f32.mxu1 %vm77_vm0, %v154_v9  ;;  %v149_v22 = vmul.f32 %v1675_v55, %v111_v44  ;;  %v130_v20 = vmul.f32 %v1636_v24, %v115_v15  ;;  %v176_v23 = vmul.f32 %v1644_v29, %v115_v15  ;;  %v657_v9 = vld [vmem:[#allocation15] sm:$0x1] }
  0x4f   :  { %1204 = vmatmul.mubr.msk.f32.vlgmr.msra.gmra.mrb[0].mxu0 %vm77_vm0, %v132_v48  ;;  %1224 = vmatmul.mubr.msk.f32.vlgmr.msra.gmra.mrb[0].mxu1 %vm77_vm0, %v155_v14  ;;  %v150_v21 = vmul.f32 %v1675_v55, %v112_v45  ;;  %v137_v26 = vadd.f32 %v129_v18, %v106_v3  ;;  %v183_v27 = vadd.f32 %v175_v19, %v106_v3  ;;  %v681_v5 = vlaneseq  ;;  %v1746_v14 = vld [vmem:[#allocation13] ss:$0 sm:$0xff] }
  0x50   :  { %1311 = vpow2.f32 %v1105_v56  ;;  %1206 = vmatprep.mubr.msk.f32.mxu0 %vm77_vm0, %v133_v51  ;;  %1294 = vmatpush3.bf16.msra.mxu0 %v1291_v25  ;;  %v156_v25 = vadd.f32 %v148_v16, %v1649_v33  ;;  %v157_v28 = vadd.f32 %v149_v22, %v1652_v35  ;;  %v138_v30 = vadd.f32 %v130_v20, %v107_v7 }
  0x51   :  { %1313 = vpow2.f32 %v1106_v57  ;;  %1296 = vmatprep.subr.bf16.mxu0 %v1295_v37  ;;  %v184_v31 = vadd.f32 %v176_v23, %v107_v7  ;;  %v158_v32 = vadd.f32 %v150_v21, %v1654_v36  ;;  %v151_v24 = vmul.f32 %v1675_v55, %v113_v63  ;;  %v948_v63 = vld [vmem:[%s1891_s9] sm:$0xff] }
  0x52   :  { %1315 = vpow2.f32 %v1107_v60  ;;  %1226 = vmatprep.mubr.msk.f32.mxu1 %vm77_vm0, %v156_v25  ;;  %v1111_v29 = vmul.f32 -1.442695, %v183_v27  ;;  %v152_v33 = vmul.f32 %v1675_v55, %v114_v13  ;;  %v153_v35 = vmul.f32 %v1675_v55, %v115_v15 }
  0x53   :  { %1317 = vpow2.f32 %v1108_v4  ;;  %1207 = vmatmul.mubr.msk.f32.gmra.mrb[2].mxu0 %vm77_vm0, %v134_v61  ;;  %1227 = vmatmul.mubr.msk.f32.gmra.mrb[2].mxu1 %vm77_vm0, %v157_v28  ;;  %v159_v38 = vadd.f32 %v151_v24, %v1666_v50  ;;  %v682_v6 = vshrl.u32 %v681_v5, 7  ;;  %v750_v12 = vsub.f32 0.0, %v657_v9 }
  0x54   :  { %1319 = vpow2.f32 %v1109_v8  ;;  %1209 = vmatprep.mubr.msk.f32.mxu0 %vm77_vm0, %v135_v0  ;;  %1298 = vmatpush3.bf16.msra.mxu0 %v1295_v37  ;;  %v1112_v37 = vmul.f32 -1.442695, %v184_v31  ;;  %v160_v36 = vadd.f32 %v152_v33, %v106_v3  ;;  %v161_v47 = vadd.f32 %v153_v35, %v107_v7  ;;  %v949_v0 = vld [vmem:[%s1891_s9 + $0x8] sm:$0xff]  ;;  %v951_v3 = vld [vmem:[%s1891_s9 + $0x18] sm:$0xff] }
  0x55   :  { %1321 = vpow2.f32 %v1110_v17  ;;  %1229 = vmatprep.mubr.msk.f32.mxu1 %vm77_vm0, %v158_v32  ;;  %v1299_v1 = vpack.c.bf16 %v949_v0, %v948_v63  ;;  %v1303_v4 = vpack.c.bf16 %v951_v3, %v950_v2  ;;  %v683_v10 = vsub.s32 0, %v682_v6 }
  0x56   :  { %1323 = vpow2.f32 %v1111_v29 }
  0x57   :  { %1210 = vmatmul.mubr.msk.f32.gmra.mrb[4].mxu0 %vm77_vm0, %v136_v11  ;;  %1325 = vpow2.f32 %v1112_v37  ;;  %1230 = vmatmul.mubr.msk.f32.gmra.mrb[4].mxu1 %vm77_vm0, %v159_v38  ;;  %v1749_v15 = vrot.slane %v657_v9, %v683_v10  ;;  %v1753_v20 = vrot.slane %v750_v12, %v683_v10 }
  0x58   :  { %1212 = vmatprep.mubr.msk.f32.mxu0 %vm77_vm0, %v137_v26  ;;  %1232 = vmatprep.mubr.msk.f32.mxu1 %vm77_vm0, %v160_v36 }
  0x59   :  { %1300 = vmatprep.subr.bf16.mxu1 %v1299_v1 }
  0x5a   :  { %v1312_v34 = vpop.eup %1311  ;;  %1302 = vmatpush3.bf16.msra.mxu1 %v1299_v1 }
  0x5b   :  { %v1314_v39 = vpop.eup %1313  ;;  %v209_v40 = vadd.f32 1.0, %v1312_v34  ;;  %1213 = vmatmul.mubr.msk.f32.gmra.mrb[6].mxu0 %vm77_vm0, %v138_v30  ;;  %1233 = vmatmul.mubr.msk.f32.gmra.mrb[6].mxu1 %vm77_vm0, %v161_v47 }
  0x5c   :  { %v1316_v41 = vpop.eup %1315  ;;  %v210_v42 = vadd.f32 1.0, %v1314_v39  ;;  %1304 = vmatprep.subr.bf16.mxu1 %v1303_v4 }
  0x5d   :  { %v1318_v43 = vpop.eup %1317  ;;  %1327 = vrcp.f32 %v209_v40  ;;  %v211_v44 = vadd.f32 1.0, %v1316_v41 }
  0x5e   :  { %v1320_v45 = vpop.eup %1319  ;;  %1329 = vrcp.f32 %v210_v42  ;;  %v212_v46 = vadd.f32 1.0, %v1318_v43  ;;  %1306 = vmatpush3.bf16.msra.mxu1 %v1303_v4 }
  0x5f   :  { %1331 = vrcp.f32 %v211_v44  ;;  %v213_v48 = vadd.f32 1.0, %v1320_v45  ;;  %v1322_v49 = vpop.eup %1321 }
  0x60   :  { %1333 = vrcp.f32 %v212_v46  ;;  %v214_v50 = vadd.f32 1.0, %v1322_v49  ;;  %v1324_v51 = vpop.eup %1323 }
  0x61   :  { %1335 = vrcp.f32 %v213_v48  ;;  %v1326_v52 = vpop.eup %1325  ;;  %v215_v53 = vadd.f32 1.0, %v1324_v51 }
  0x62   :  { %1337 = vrcp.f32 %v214_v50  ;;  %v216_v55 = vadd.f32 1.0, %v1326_v52 }
  0x63   :  { %1339 = vrcp.f32 %v215_v53 }
  0x64   :  { %1341 = vrcp.f32 %v216_v55 }
  0x67   :  { %v1328_v54 = vpop.eup %1327 }
  0x68   :  { %v1330_v56 = vpop.eup %1329  ;;  %1243 = vmatprep.mubr.msk.f32.mxu0 %vm77_vm0, %v1328_v54 }
  0x69   :  { %v1332_v57 = vpop.eup %1331  ;;  %1244 = vmatmul.mubr.msk.f32.vlgmr.msra.gmra.mrb[8].mxu0 %vm77_vm0, %v1330_v56 }
  0x6a   :  { %v1334_v58 = vpop.eup %1333  ;;  %1246 = vmatprep.mubr.msk.f32.mxu0 %vm77_vm0, %v1332_v57 }
  0x6b   :  { %v1336_v59 = vpop.eup %1335 }
  0x6c   :  { %v1338_v60 = vpop.eup %1337 }
  0x6d   :  { %1247 = vmatmul.mubr.msk.f32.gmra.mrb[10].mxu0 %vm77_vm0, %v1334_v58  ;;  %v1340_v61 = vpop.eup %1339 }
  0x6e   :  { %1249 = vmatprep.mubr.msk.f32.mxu0 %vm77_vm0, %v1336_v59  ;;  %v1342_v62 = vpop.eup %1341 }
  0x71   :  { %1250 = vmatmul.mubr.msk.f32.gmra.mrb[12].mxu0 %vm77_vm0, %v1338_v60 }
  0x72   :  { %1252 = vmatprep.mubr.msk.f32.mxu0 %vm77_vm0, %v1340_v61 }
  0x75   :  { %1253 = vmatmul.mubr.msk.f32.gmra.mrb[14].mxu0 %vm77_vm0, %v1342_v62 }
 0x122   :  { %v1205_v7 = vpop.f32.mrb[0].mxu0  ;;  %v1225_v16 = vpop.f32.mrb[0].mxu1 }
 0x123   :  { %367 = vst.msk [vmem:[#allocation3 + $0x8] sm:$0xff] %vm77_vm0, %v1205_v7  ;;  %v327_v8 = vpop.f32.mrb[1].mxu0  ;;  %508 = vst.msk [vmem:[#allocation4 + $0x8] sm:$0xff] %vm77_vm0, %v1225_v16  ;;  %v468_v19 = vpop.f32.mrb[1].mxu1 }
 0x124   :  { %366 = vst.msk [vmem:[#allocation3] sm:$0xff] %vm77_vm0, %v327_v8  ;;  %507 = vst.msk [vmem:[#allocation4] sm:$0xff] %vm77_vm0, %v468_v19 }
 0x126   :  { %v1208_v11 = vpop.f32.mrb[2].mxu0  ;;  %v1228_v27 = vpop.f32.mrb[2].mxu1 }
 0x127   :  { %369 = vst.msk [vmem:[#allocation3 + $0x18] sm:$0xff] %vm77_vm0, %v1208_v11  ;;  %v337_v13 = vpop.f32.mrb[3].mxu0  ;;  %510 = vst.msk [vmem:[#allocation4 + $0x18] sm:$0xff] %vm77_vm0, %v1228_v27  ;;  %v478_v32 = vpop.f32.mrb[3].mxu1 }
 0x128   :  { %368 = vst.msk [vmem:[#allocation3 + $0x10] sm:$0xff] %vm77_vm0, %v337_v13  ;;  %509 = vst.msk [vmem:[#allocation4 + $0x10] sm:$0xff] %vm77_vm0, %v478_v32 }
 0x12a   :  { %v659_v17 = vld [vmem:[#allocation3 + $0x8] sm:$0xff]  ;;  %v1211_v18 = vpop.f32.mrb[4].mxu0  ;;  %v1231_v42 = vpop.f32.mrb[4].mxu1 }
 0x12b   :  { %v673_v22 = vadd.f32 %v1746_v14, %v659_v17  ;;  %v658_v23 = vld [vmem:[#allocation3] sm:$0xff]  ;;  %371 = vst.msk [vmem:[#allocation3 + $0x28] sm:$0xff] %vm77_vm0, %v1211_v18  ;;  %v347_v25 = vpop.f32.mrb[5].mxu0  ;;  %512 = vst.msk [vmem:[#allocation4 + $0x28] sm:$0xff] %vm77_vm0, %v1231_v42  ;;  %v488_v51 = vpop.f32.mrb[5].mxu1  ;;  %v719_v13 = vld [vmem:[#allocation4 + $0x8] sm:$0xff] }
 0x12c   :  { %v672_v21 = vadd.f32 %v1746_v14, %v658_v23  ;;  %370 = vst.msk [vmem:[#allocation3 + $0x20] sm:$0xff] %vm77_vm0, %v347_v25  ;;  %511 = vst.msk [vmem:[#allocation4 + $0x20] sm:$0xff] %vm77_vm0, %v488_v51  ;;  %v718_v23 = vld [vmem:[#allocation4] sm:$0xff] }
 0x12d   :  { %v687_v26 = vmax.f32 %v673_v22, %v1749_v15 }
 0x12e   :  { %v686_v28 = vmax.f32 %v672_v21, %v1749_v15  ;;  %v661_v30 = vld [vmem:[#allocation3 + $0x18] sm:$0xff]  ;;  %v1214_v31 = vpop.f32.mrb[6].mxu0  ;;  %v1234_v58 = vpop.f32.mrb[6].mxu1 }
 0x12f   :  { %v695_v24 = vsub.f32 %v673_v22, %v687_v26  ;;  %v758_v29 = vsub.f32 %v1753_v20, %v687_v26  ;;  %v675_v33 = vadd.f32 %v1746_v14, %v661_v30  ;;  %v660_v34 = vld [vmem:[#allocation3 + $0x10] sm:$0xff]  ;;  %373 = vst.msk [vmem:[#allocation3 + $0x38] sm:$0xff] %vm77_vm0, %v1214_v31  ;;  %v357_v37 = vpop.f32.mrb[7].mxu0  ;;  %514 = vst.msk [vmem:[#allocation4 + $0x38] sm:$0xff] %vm77_vm0, %v1234_v58  ;;  %v498_v3 = vpop.f32.mrb[7].mxu1 }
 0x130   :  { %v694_v38 = vsub.f32 %v672_v21, %v686_v28  ;;  %v757_v35 = vsub.f32 %v1753_v20, %v686_v28  ;;  %v674_v39 = vadd.f32 %v1746_v14, %v660_v34  ;;  %372 = vst.msk [vmem:[#allocation3 + $0x30] sm:$0xff] %vm77_vm0, %v357_v37  ;;  %513 = vst.msk [vmem:[#allocation4 + $0x30] sm:$0xff] %vm77_vm0, %v498_v3  ;;  %v720_v34 = vld [vmem:[#allocation4 + $0x10] sm:$0xff] }
 0x131   :  { %v704_v40 = vmul.f32 1.442695, %v695_v24  ;;  %v767_v36 = vmul.f32 1.442695, %v758_v29  ;;  %v689_v41 = vmax.f32 %v675_v33, %v1749_v15 }
 0x132   :  { %v702_v43 = vmul.f32 1.442695, %v694_v38  ;;  %v765_v44 = vmul.f32 1.442695, %v757_v35  ;;  %v688_v45 = vmax.f32 %v674_v39, %v1749_v15  ;;  %v663_v46 = vld [vmem:[#allocation3 + $0x28] sm:$0xff] }
 0x133   :  { %1343 = vpow2.f32 %v704_v40  ;;  %v697_v47 = vsub.f32 %v675_v33, %v689_v41  ;;  %v760_v48 = vsub.f32 %v1753_v20, %v689_v41  ;;  %v677_v49 = vadd.f32 %v1746_v14, %v663_v46  ;;  %v662_v50 = vld [vmem:[#allocation3 + $0x20] sm:$0xff]  ;;  %v723_v40 = vld [vmem:[#allocation4 + $0x28] sm:$0xff] }
 0x134   :  { %1345 = vpow2.f32 %v767_v36  ;;  %v696_v52 = vsub.f32 %v674_v39, %v688_v45  ;;  %v759_v53 = vsub.f32 %v1753_v20, %v688_v45  ;;  %v676_v54 = vadd.f32 %v1746_v14, %v662_v50 }
 0x135   :  { %1347 = vpow2.f32 %v702_v43  ;;  %v708_v55 = vmul.f32 1.442695, %v697_v47  ;;  %v771_v56 = vmul.f32 1.442695, %v760_v48  ;;  %v691_v57 = vmax.f32 %v677_v49, %v1749_v15  ;;  %v789_v47 = vld [vmem:[#allocation8] sm:$0xff]  ;;  %v790_v48 = vld [vmem:[#allocation9] sm:$0xff] }
 0x136   :  { %1349 = vpow2.f32 %v765_v44  ;;  %v706_v59 = vmul.f32 1.442695, %v696_v52  ;;  %v769_v60 = vmul.f32 1.442695, %v759_v53  ;;  %v690_v61 = vmax.f32 %v676_v54, %v1749_v15  ;;  %v665_v62 = vld [vmem:[#allocation3 + $0x38] sm:$0xff]  ;;  %v722_v44 = vld [vmem:[#allocation4 + $0x20] sm:$0xff] }
 0x137   :  { %1351 = vpow2.f32 %v708_v55  ;;  %v699_v63 = vsub.f32 %v677_v49, %v691_v57  ;;  %v762_v0 = vsub.f32 %v1753_v20, %v691_v57  ;;  %v679_v1 = vadd.f32 %v1746_v14, %v665_v62  ;;  %v664_v2 = vld [vmem:[#allocation3 + $0x30] sm:$0xff]  ;;  %v725_v51 = vld [vmem:[#allocation4 + $0x38] sm:$0xff] }
 0x138   :  { %1353 = vpow2.f32 %v771_v56  ;;  %v698_v4 = vsub.f32 %v676_v54, %v690_v61  ;;  %v761_v5 = vsub.f32 %v1753_v20, %v690_v61  ;;  %v678_v6 = vadd.f32 %v1746_v14, %v664_v2 }
 0x139   :  { %1355 = vpow2.f32 %v706_v59  ;;  %v712_v7 = vmul.f32 1.442695, %v699_v63  ;;  %v775_v8 = vmul.f32 1.442695, %v762_v0  ;;  %v693_v9 = vmax.f32 %v679_v1, %v1749_v15 }
 0x13a   :  { %1357 = vpow2.f32 %v769_v60  ;;  %v710_v10 = vmul.f32 1.442695, %v698_v4  ;;  %v773_v11 = vmul.f32 1.442695, %v761_v5  ;;  %v692_v12 = vmax.f32 %v678_v6, %v1749_v15  ;;  %v724_v60 = vld [vmem:[#allocation4 + $0x30] sm:$0xff] }
 0x13b   :  { %1359 = vpow2.f32 %v712_v7  ;;  %v701_v16 = vsub.f32 %v679_v1, %v693_v9  ;;  %v764_v17 = vsub.f32 %v1753_v20, %v693_v9 }
 0x13c   :  { %1361 = vpow2.f32 %v775_v8  ;;  %v700_v18 = vsub.f32 %v678_v6, %v692_v12  ;;  %v763_v14 = vsub.f32 %v1753_v20, %v692_v12  ;;  %v1245_v19 = vpop.f32.mrb[8].mxu0  ;;  %v721_v20 = vld [vmem:[#allocation4 + $0x18] sm:$0xff] }
 0x13d   :  { %v1344_v22 = vpop.eup %1343  ;;  %1363 = vpow2.f32 %v710_v10  ;;  %v716_v25 = vmul.f32 1.442695, %v701_v16  ;;  %v779_v21 = vmul.f32 1.442695, %v764_v17  ;;  %649 = vst.msk [vmem:[#allocation5 + $0x8] sm:$0xff] %vm77_vm0, %v1245_v19  ;;  %v609_v26 = vpop.f32.mrb[9].mxu0 }
 0x13e   :  { %v1346_v27 = vpop.eup %1345  ;;  %743 = vst.msk [vmem:[#allocation2 + $0x8] sm:$0xff] %vm77_vm0, %v1344_v22  ;;  %1365 = vpow2.f32 %v773_v11  ;;  %v727_v15 = vmul.f32 %v1344_v22, %v719_v13  ;;  %v714_v28 = vmul.f32 1.442695, %v700_v18  ;;  %v777_v30 = vmul.f32 1.442695, %v763_v14  ;;  %648 = vst.msk [vmem:[#allocation5] sm:$0xff] %vm77_vm0, %v609_v26 }
 0x13f   :  { %v1348_v31 = vpop.eup %1347  ;;  %782 = vst.msk [vmem:[#allocation3 + $0x8] sm:$0xff] %vm77_vm0, %v1346_v27  ;;  %1367 = vpow2.f32 %v716_v25 }
 0x140   :  { %v1350_v32 = vpop.eup %1349  ;;  %742 = vst.msk [vmem:[#allocation2] sm:$0xff] %vm77_vm0, %v1348_v31  ;;  %735 = vst.msk [vmem:[#allocation4 + $0x8] sm:$0xff] %vm77_vm0, %v727_v15  ;;  %v726_v24 = vmul.f32 %v1348_v31, %v718_v23  ;;  %1369 = vpow2.f32 %v779_v21  ;;  %v1248_v29 = vpop.f32.mrb[10].mxu0 }
 0x141   :  { %v1352_v33 = vpop.eup %1351  ;;  %781 = vst.msk [vmem:[#allocation3] sm:$0xff] %vm77_vm0, %v1350_v32  ;;  %1371 = vpow2.f32 %v714_v28  ;;  %651 = vst.msk [vmem:[#allocation5 + $0x18] sm:$0xff] %vm77_vm0, %v1248_v29  ;;  %v619_v37 = vpop.f32.mrb[11].mxu0 }
 0x142   :  { %v1354_v38 = vpop.eup %1353  ;;  %745 = vst.msk [vmem:[#allocation2 + $0x18] sm:$0xff] %vm77_vm0, %v1352_v33  ;;  %734 = vst.msk [vmem:[#allocation4] sm:$0xff] %vm77_vm0, %v726_v24  ;;  %1373 = vpow2.f32 %v777_v30  ;;  %v729_v35 = vmul.f32 %v1352_v33, %v721_v20 }
 0x143   :  { %650 = vst.msk [vmem:[#allocation5 + $0x10] sm:$0xff] %vm77_vm0, %v619_v37  ;;  %v1356_v39 = vpop.eup %1355  ;;  %784 = vst.msk [vmem:[#allocation3 + $0x18] sm:$0xff] %vm77_vm0, %v1354_v38 }
 0x144   :  { %v1358_v36 = vpop.eup %1357  ;;  %744 = vst.msk [vmem:[#allocation2 + $0x10] sm:$0xff] %vm77_vm0, %v1356_v39  ;;  %737 = vst.msk [vmem:[#allocation4 + $0x18] sm:$0xff] %vm77_vm0, %v729_v35  ;;  %v728_v41 = vmul.f32 %v1356_v39, %v720_v34  ;;  %v1251_v42 = vpop.f32.mrb[12].mxu0 }
 0x145   :  { %v1360_v43 = vpop.eup %1359  ;;  %783 = vst.msk [vmem:[#allocation3 + $0x10] sm:$0xff] %vm77_vm0, %v1358_v36  ;;  %653 = vst.msk [vmem:[#allocation5 + $0x28] sm:$0xff] %vm77_vm0, %v1251_v42  ;;  %v629_v45 = vpop.f32.mrb[13].mxu0  ;;  %v803_v9 = vld [vmem:[#allocation2 + $0x8] sm:$0xff] }
 0x146   :  { %v1362_v46 = vpop.eup %1361  ;;  %747 = vst.msk [vmem:[#allocation2 + $0x28] sm:$0xff] %vm77_vm0, %v1360_v43  ;;  %736 = vst.msk [vmem:[#allocation4 + $0x10] sm:$0xff] %vm77_vm0, %v728_v41  ;;  %v731_v49 = vmul.f32 %v1360_v43, %v723_v40  ;;  %v801_v5 = vld [vmem:[#allocation3 + $0x8] sm:$0xff] }
 0x147   :  { %652 = vst.msk [vmem:[#allocation5 + $0x20] sm:$0xff] %vm77_vm0, %v629_v45  ;;  %v1364_v50 = vpop.eup %1363  ;;  %786 = vst.msk [vmem:[#allocation3 + $0x28] sm:$0xff] %vm77_vm0, %v1362_v46  ;;  %v792_v63 = vld [vmem:[#allocation2] sm:$0xff]  ;;  %v805_v11 = vld [vmem:[#allocation4 + $0x8] sm:$0xff] }
 0x148   :  { %v1366_v52 = vpop.eup %1365  ;;  %v791_v53 = vld [vmem:[#allocation3] sm:$0xff]  ;;  %746 = vst.msk [vmem:[#allocation2 + $0x20] sm:$0xff] %vm77_vm0, %v1364_v50  ;;  %739 = vst.msk [vmem:[#allocation4 + $0x28] sm:$0xff] %vm77_vm0, %v731_v49  ;;  %v730_v54 = vmul.f32 %v1364_v50, %v722_v44  ;;  %v1254_v55 = vpop.f32.mrb[14].mxu0 }
 0x149   :  { %v1368_v56 = vpop.eup %1367  ;;  %v794_v57 = vmul.f32 %v791_v53, %v789_v47  ;;  %v796_v58 = vmul.f32 %v791_v53, %v790_v48  ;;  %785 = vst.msk [vmem:[#allocation3 + $0x20] sm:$0xff] %vm77_vm0, %v1366_v52  ;;  %v793_v59 = vld [vmem:[#allocation4] sm:$0xff]  ;;  %655 = vst.msk [vmem:[#allocation5 + $0x38] sm:$0xff] %vm77_vm0, %v1254_v55  ;;  %v639_v61 = vpop.f32.mrb[15].mxu0  ;;  %v831_v27 = vld [vmem:[#allocation2 + $0x18] sm:$0xff] }
 0x14a   :  { %v1370_v62 = vpop.eup %1369  ;;  %749 = vst.msk [vmem:[#allocation2 + $0x38] sm:$0xff] %vm77_vm0, %v1368_v56  ;;  %738 = vst.msk [vmem:[#allocation4 + $0x20] sm:$0xff] %vm77_vm0, %v730_v54  ;;  %v733_v0 = vmul.f32 %v1368_v56, %v725_v51  ;;  %v829_v23 = vld [vmem:[#allocation3 + $0x18] sm:$0xff]  ;;  %v932_v47 = vld [vmem:[#allocation5] sm:$0xff] }
 0x14b   :  { %654 = vst.msk [vmem:[#allocation5 + $0x30] sm:$0xff] %vm77_vm0, %v639_v61  ;;  %v1372_v1 = vpop.eup %1371  ;;  %v797_v2 = vadd.f32 %v796_v58, %v792_v63  ;;  %v795_v3 = vadd.f32 %v794_v57, %v793_v59  ;;  %788 = vst.msk [vmem:[#allocation3 + $0x38] sm:$0xff] %vm77_vm0, %v1370_v62  ;;  %v817_v18 = vld [vmem:[#allocation2 + $0x10] sm:$0xff]  ;;  %v833_v28 = vld [vmem:[#allocation4 + $0x18] sm:$0xff] }
 0x14c   :  { %v1374_v4 = vpop.eup %1373  ;;  %748 = vst.msk [vmem:[#allocation2 + $0x30] sm:$0xff] %vm77_vm0, %v1372_v1  ;;  %741 = vst.msk [vmem:[#allocation4 + $0x38] sm:$0xff] %vm77_vm0, %v733_v0  ;;  %v732_v6 = vmul.f32 %v1372_v1, %v724_v60  ;;  %v815_v10 = vld [vmem:[#allocation3 + $0x10] sm:$0xff]  ;;  %v933_v59 = vld [vmem:[#allocation5 + $0x8] sm:$0xff] }
 0x14d   :  { %799 = vst.msk [vmem:[#allocation7] sm:$0xff] %vm77_vm0, %v797_v2  ;;  %v808_v7 = vmul.f32 %v801_v5, %v797_v2  ;;  %v806_v8 = vmul.f32 %v801_v5, %v795_v3  ;;  %798 = vst.msk [vmem:[#allocation6] sm:$0xff] %vm77_vm0, %v795_v3  ;;  %v819_v14 = vld [vmem:[#allocation4 + $0x10] sm:$0xff]  ;;  %v859_v36 = vld [vmem:[#allocation2 + $0x28] sm:$0xff] }
 0x14e   :  { %787 = vst.msk [vmem:[#allocation3 + $0x30] sm:$0xff] %vm77_vm0, %v1374_v4  ;;  %740 = vst.msk [vmem:[#allocation4 + $0x30] sm:$0xff] %vm77_vm0, %v732_v6  ;;  %v857_v38 = vld [vmem:[#allocation3 + $0x28] sm:$0xff] }
 0x14f   :  { %v809_v12 = vadd.f32 %v808_v7, %v803_v9  ;;  %v807_v13 = vadd.f32 %v806_v8, %v805_v11  ;;  %v845_v29 = vld [vmem:[#allocation2 + $0x20] sm:$0xff]  ;;  %v861_v42 = vld [vmem:[#allocation4 + $0x28] sm:$0xff]  ;;  %v934_v8 = vld [vmem:[#allocation5 + $0x10] sm:$0xff] }
 0x150   :  { %v843_v15 = vld [vmem:[#allocation3 + $0x20] sm:$0xff] }
 0x151   :  { %813 = vst.msk [vmem:[#allocation7 + $0x8] sm:$0xff] %vm77_vm0, %v809_v12  ;;  %v822_v16 = vmul.f32 %v815_v10, %v809_v12  ;;  %811 = vst.msk [vmem:[#allocation6 + $0x8] sm:$0xff] %vm77_vm0, %v807_v13  ;;  %v820_v17 = vmul.f32 %v815_v10, %v807_v13  ;;  %v847_v33 = vld [vmem:[#allocation4 + $0x20] sm:$0xff]  ;;  %v887_v1 = vld [vmem:[#allocation2 + $0x38] sm:$0xff] }
 0x152   :  { %v885_v60 = vld [vmem:[#allocation3 + $0x38] sm:$0xff] }
 0x153   :  { %v823_v19 = vadd.f32 %v822_v16, %v817_v18  ;;  %v821_v22 = vadd.f32 %v820_v17, %v819_v14  ;;  %v873_v52 = vld [vmem:[#allocation2 + $0x30] sm:$0xff]  ;;  %v889_v2 = vld [vmem:[#allocation4 + $0x38] sm:$0xff] }
 0x154   :  { %v908_v25 = vld [vmem:[#allocation7] sm:$0xff]  ;;  %v935_v16 = vld [vmem:[#allocation5 + $0x18] sm:$0xff] }
 0x155   :  { %827 = vst.msk [vmem:[#allocation7 + $0x10] sm:$0xff] %vm77_vm0, %v823_v19  ;;  %v836_v21 = vmul.f32 %v829_v23, %v823_v19  ;;  %v834_v26 = vmul.f32 %v829_v23, %v821_v22  ;;  %825 = vst.msk [vmem:[#allocation6 + $0x10] sm:$0xff] %vm77_vm0, %v821_v22  ;;  %1375 = vrcp.f32 %v908_v25  ;;  %v871_v41 = vld [vmem:[#allocation3 + $0x30] sm:$0xff]  ;;  %v900_v46 = vld [vmem:[#allocation6] sm:$0xff] }
 0x156   :  { %v875_v53 = vld [vmem:[#allocation4 + $0x30] sm:$0xff]  ;;  %v936_v23 = vld [vmem:[#allocation5 + $0x20] sm:$0xff] }
 0x157   :  { %v837_v30 = vadd.f32 %v836_v21, %v831_v27  ;;  %v835_v31 = vadd.f32 %v834_v26, %v833_v28  ;;  %v937_v28 = vld [vmem:[#allocation5 + $0x28] sm:$0xff] }
 0x158   :  { %v909_v20 = vld [vmem:[#allocation7 + $0x8] sm:$0xff] }
 0x159   :  { %841 = vst.msk [vmem:[#allocation7 + $0x18] sm:$0xff] %vm77_vm0, %v837_v30  ;;  %v850_v32 = vmul.f32 %v843_v15, %v837_v30  ;;  %v848_v24 = vmul.f32 %v843_v15, %v835_v31  ;;  %839 = vst.msk [vmem:[#allocation6 + $0x18] sm:$0xff] %vm77_vm0, %v835_v31  ;;  %1377 = vrcp.f32 %v909_v20  ;;  %v901_v58 = vld [vmem:[#allocation6 + $0x8] sm:$0xff] }
 0x15b   :  { %v851_v34 = vadd.f32 %v850_v32, %v845_v29  ;;  %v849_v37 = vadd.f32 %v848_v24, %v847_v33  ;;  %v938_v24 = vld [vmem:[#allocation5 + $0x30] sm:$0xff] }
 0x15c   :  { %v910_v35 = vld [vmem:[#allocation7 + $0x10] sm:$0xff] }
 0x15d   :  { %855 = vst.msk [vmem:[#allocation7 + $0x20] sm:$0xff] %vm77_vm0, %v851_v34  ;;  %v864_v39 = vmul.f32 %v857_v38, %v851_v34  ;;  %v862_v40 = vmul.f32 %v857_v38, %v849_v37  ;;  %853 = vst.msk [vmem:[#allocation6 + $0x20] sm:$0xff] %vm77_vm0, %v849_v37  ;;  %1379 = vrcp.f32 %v910_v35  ;;  %v902_v7 = vld [vmem:[#allocation6 + $0x10] sm:$0xff]  ;;  %v939_v35 = vld [vmem:[#allocation5 + $0x38] sm:$0xff] }
 0x15f   :  { %v1376_v43 = vpop.eup %1375  ;;  %v865_v44 = vadd.f32 %v864_v39, %v859_v36  ;;  %v863_v45 = vadd.f32 %v862_v40, %v861_v42  ;;  %v1138_v40 = vld [vmem:[%s1892_s10] ss:$0 sm:$0xff] }
 0x160   :  { %v917_v48 = vmul.f32 %v1376_v43, %v900_v46  ;;  %v911_v49 = vld [vmem:[#allocation7 + $0x18] sm:$0xff] }
 0x161   :  { %869 = vst.msk [vmem:[#allocation7 + $0x28] sm:$0xff] %vm77_vm0, %v865_v44  ;;  %v878_v50 = vmul.f32 %v871_v41, %v865_v44  ;;  %v876_v51 = vmul.f32 %v871_v41, %v863_v45  ;;  %867 = vst.msk [vmem:[#allocation6 + $0x28] sm:$0xff] %vm77_vm0, %v863_v45  ;;  %1381 = vrcp.f32 %v911_v49  ;;  %v903_v13 = vld [vmem:[#allocation6 + $0x18] sm:$0xff] }
 0x162   :  { %v940_v54 = vmul.f32 %v932_v47, %v917_v48 }
 0x163   :  { %v1378_v55 = vpop.eup %1377  ;;  %v879_v56 = vadd.f32 %v878_v50, %v873_v52  ;;  %v877_v57 = vadd.f32 %v876_v51, %v875_v53 }
 0x164   :  { %1263 = vmatprep.mubr.msk.f32.mxu1 %vm77_vm0, %v940_v54  ;;  %v919_v61 = vmul.f32 %v1378_v55, %v901_v58  ;;  %v912_v62 = vld [vmem:[#allocation7 + $0x20] sm:$0xff] }
 0x165   :  { %883 = vst.msk [vmem:[#allocation7 + $0x30] sm:$0xff] %vm77_vm0, %v879_v56  ;;  %v892_v63 = vmul.f32 %v885_v60, %v879_v56  ;;  %v890_v0 = vmul.f32 %v885_v60, %v877_v57  ;;  %881 = vst.msk [vmem:[#allocation6 + $0x30] sm:$0xff] %vm77_vm0, %v877_v57  ;;  %1383 = vrcp.f32 %v912_v62  ;;  %v904_v22 = vld [vmem:[#allocation6 + $0x20] sm:$0xff] }
 0x166   :  { %v941_v3 = vmul.f32 %v933_v59, %v919_v61 }
 0x167   :  { %v1380_v4 = vpop.eup %1379  ;;  %v893_v5 = vadd.f32 %v892_v63, %v887_v1  ;;  %v891_v6 = vadd.f32 %v890_v0, %v889_v2 }
 0x168   :  { %1264 = vmatmul.mubr.msk.f32.vlgmr.msra.gmra.mrb[8].mxu1 %vm77_vm0, %v941_v3  ;;  %v921_v9 = vmul.f32 %v1380_v4, %v902_v7  ;;  %v913_v10 = vld [vmem:[#allocation7 + $0x28] sm:$0xff] }
 0x169   :  { %897 = vst.msk [vmem:[#allocation7 + $0x38] sm:$0xff] %vm77_vm0, %v893_v5  ;;  %899 = vst.msk [vmem:[#allocation9] sm:$0xff] %vm77_vm0, %v893_v5  ;;  %1385 = vrcp.f32 %v913_v10  ;;  %v905_v15 = vld [vmem:[#allocation6 + $0x28] sm:$0xff] }
 0x16a   :  { %898 = vst.msk [vmem:[#allocation8] sm:$0xff] %vm77_vm0, %v891_v6  ;;  %895 = vst.msk [vmem:[#allocation6 + $0x38] sm:$0xff] %vm77_vm0, %v891_v6  ;;  %v942_v11 = vmul.f32 %v934_v8, %v921_v9 }
 0x16b   :  { %v1382_v12 = vpop.eup %1381 }
 0x16c   :  { %1266 = vmatprep.mubr.msk.f32.mxu1 %vm77_vm0, %v942_v11  ;;  %v923_v17 = vmul.f32 %v1382_v12, %v903_v13  ;;  %v914_v18 = vld [vmem:[#allocation7 + $0x30] sm:$0xff] }
 0x16d   :  { %1387 = vrcp.f32 %v914_v18  ;;  %v906_v32 = vld [vmem:[#allocation6 + $0x30] sm:$0xff] }
 0x16e   :  { %v943_v14 = vmul.f32 %v935_v16, %v923_v17 }
 0x16f   :  { %v1384_v19 = vpop.eup %1383 }
 0x170   :  { %1267 = vmatmul.mubr.msk.f32.gmra.mrb[10].mxu1 %vm77_vm0, %v943_v14  ;;  %v925_v25 = vmul.f32 %v1384_v19, %v904_v22  ;;  %v915_v21 = vld [vmem:[#allocation7 + $0x38] sm:$0xff] }
 0x171   :  { %1389 = vrcp.f32 %v915_v21  ;;  %v907_v37 = vld [vmem:[#allocation6 + $0x38] sm:$0xff] }
 0x172   :  { %v944_v26 = vmul.f32 %v936_v23, %v925_v25 }
 0x173   :  { %v1386_v27 = vpop.eup %1385 }
 0x174   :  { %1269 = vmatprep.mubr.msk.f32.mxu1 %vm77_vm0, %v944_v26  ;;  %v927_v30 = vmul.f32 %v1386_v27, %v905_v15 }
 0x176   :  { %v945_v31 = vmul.f32 %v937_v28, %v927_v30 }
 0x177   :  { %v1388_v20 = vpop.eup %1387 }
 0x178   :  { %1270 = vmatmul.mubr.msk.f32.gmra.mrb[12].mxu1 %vm77_vm0, %v945_v31  ;;  %v929_v29 = vmul.f32 %v1388_v20, %v906_v32 }
 0x17a   :  { %v946_v33 = vmul.f32 %v938_v24, %v929_v29 }
 0x17b   :  { %v1390_v34 = vpop.eup %1389 }
 0x17c   :  { %1272 = vmatprep.mubr.msk.f32.mxu1 %vm77_vm0, %v946_v33  ;;  %v931_v38 = vmul.f32 %v1390_v34, %v907_v37 }
 0x17e   :  { %v947_v39 = vmul.f32 %v939_v35, %v931_v38 }
 0x180   :  { %1273 = vmatmul.mubr.msk.f32.gmra.mrb[14].mxu1 %vm77_vm0, %v947_v39 }
 0x23b   :  { %v1265_v36 = vpop.f32.mrb[8].mxu1 }
 0x23c   :  { %v1055_v41 = vadd.f32 %v1265_v36, %v1138_v40  ;;  %v1049_v42 = vpop.f32.mrb[9].mxu1 }
 0x23d   :  { %v1050_v43 = vadd.f32 %v1138_v40, %v1049_v42 }
 0x23e   :  { %1089 = vst.msk [vmem:[%s1893_s11 + $0x8] sm:$0xff] %vm77_vm0, %v1055_v41 }
 0x23f   :  { %1088 = vst.msk [vmem:[%s1893_s11] sm:$0xff] %vm77_vm0, %v1050_v43 }
 0x243   :  { %v1268_v44 = vpop.f32.mrb[10].mxu1 }
 0x244   :  { %v1065_v45 = vadd.f32 %v1268_v44, %v1138_v40  ;;  %v1059_v46 = vpop.f32.mrb[11].mxu1 }
 0x245   :  { %v1060_v47 = vadd.f32 %v1138_v40, %v1059_v46 }
 0x246   :  { %1091 = vst.msk [vmem:[%s1893_s11 + $0x18] sm:$0xff] %vm77_vm0, %v1065_v45 }
 0x247   :  { %1090 = vst.msk [vmem:[%s1893_s11 + $0x10] sm:$0xff] %vm77_vm0, %v1060_v47 }
 0x24b   :  { %v1271_v48 = vpop.f32.mrb[12].mxu1 }
 0x24c   :  { %v1075_v49 = vadd.f32 %v1271_v48, %v1138_v40  ;;  %v1069_v50 = vpop.f32.mrb[13].mxu1 }
 0x24d   :  { %v1070_v51 = vadd.f32 %v1138_v40, %v1069_v50 }
 0x24e   :  { %1093 = vst.msk [vmem:[%s1893_s11 + $0x28] sm:$0xff] %vm77_vm0, %v1075_v49 }
 0x24f   :  { %1092 = vst.msk [vmem:[%s1893_s11 + $0x20] sm:$0xff] %vm77_vm0, %v1070_v51 }
 0x253   :  { %v1274_v52 = vpop.f32.mrb[14].mxu1 }
 0x254   :  { %v1085_v53 = vadd.f32 %v1274_v52, %v1138_v40  ;;  %v1079_v54 = vpop.f32.mrb[15].mxu1 }
 0x255   :  { %v1080_v55 = vadd.f32 %v1138_v40, %v1079_v54 }
 0x256   :  { %1095 = vst.msk [vmem:[%s1893_s11 + $0x38] sm:$0xff] %vm77_vm0, %v1085_v53 }
 0x257   :  { %1094 = vst.msk [vmem:[%s1893_s11 + $0x30] sm:$0xff] %vm77_vm0, %v1080_v55 }
 0x258   :  { %1100 = vsyncpa [#allocation12], 1 }
 0x259   :  { %1101 = vsyncpa [#allocation14], 1 }

</bundles_post_ra>
